<compile_context>
chip_gen: v7x
topology: tpu7x:2x2x1
jax: 0.10.0
libtpu: 0.0.40
codegen_flags: <defaults>
</compile_context>

<pallas_src>
import jax
import jax.numpy as jnp
import numpy as np
from jax import lax
from jax.experimental import pallas as pl
from jax.experimental.pallas import tpu as pltpu

# ----- hyperparameters (small, consistent with the module's forward) -----
BATCH = 2            # batch_size
NPRATIO = 4
CDD = NPRATIO + 1    # cdd_size = 5
HIS = 4              # his_size
SIG_LEN = 8          # signal_length (title_size)
EMB_DIM = 32         # embedding_dim
VOCAB = 100
KERNEL_NUM = 20      # len(torch.arange(-0.9, 1.1, 0.1)) -> 20 kernels

CL = CDD * SIG_LEN           # 40 candidate tokens per batch
HL = HIS * SIG_LEN           # 32 history tokens per batch
KHL = KERNEL_NUM * HL        # 640 lanes in the lane-dense RBF stage
KH = KERNEL_NUM * HIS        # 80
NTOK = BATCH * (CL + HL)     # 144 gathered token rows (all batches, cdd then his)
HIS_OFF = BATCH * CL         # 80: first history row inside the fused token slab

MUS = np.linspace(-0.9, 1.0, KERNEL_NUM).astype(np.float32)             # -0.9 ... 1.0
SIGMAS = np.array([0.1] * (KERNEL_NUM - 1) + [0.001], dtype=np.float32)

# Sentinel similarity for padded history tokens: exp(-(1e4 - mu)^2 / (2 sigma^2))
# underflows to exactly 0.0 in f32 -- identical to multiplying the RBF by a 0 mask.
_MASK_SENTINEL = 1.0e4


def _knrm_kernel(emb_ref, ids_ref, cpad_ref, hpad_ref, invc_ref, munis_ref,
                 tile_ref, rlk_ref, rh_ref, w_ref, b_ref, out_ref):
    """Fully fused KNRM forward for the whole (tiny) batch.

       emb_ref   [V, D]        embedding table
       ids_ref   [NTOK, 1]     all token ids (cdd tokens of all batches, then his tokens)
       cpad_ref  [B, C*L]      candidate token pad mask
       hpad_ref  [B, H*L]      history token pad mask
       invc_ref  [B, 1]        1 / his_mask_count
       munis_ref [2, K*H*L]    row0 = mu_k (k-major over (h,lk)), row1 = -1/(2 sigma_k^2)
       tile_ref  [H*L, K*H*L]  lane-tiling 0/1 matrix (bf16, exact)
       rlk_ref   [K*H*L, K*H]  sum over history tokens lk (bf16 0/1)
       rh_ref    [K*H, K]      sum over history items h (bf16 0/1)
       w_ref     [1, K]        learningToRank weight
       b_ref     [1, 1]        learningToRank bias
       out_ref   [B, C]        log_softmax scores
    """
    # L2-normalize the embedding table once, then gather every token row of the
    # whole batch with a single one-hot matmul (MXU). Rows come out already
    # normalized == F.normalize on the gathered embeddings.
    emb = emb_ref[...]
    emb_n = emb * lax.rsqrt(jnp.maximum(jnp.sum(emb * emb, axis=-1, keepdims=True), 1e-24))
    ids = ids_ref[...]                                                   # [NTOK, 1] int32
    onehot = (ids == lax.broadcasted_iota(jnp.int32, (NTOK, VOCAB), 1)).astype(jnp.float32)
    tok = jnp.dot(onehot, emb_n, preferred_element_type=jnp.float32)     # [NTOK, D]

    munis = munis_ref[...]                                               # [2, KHL]
    mu = munis[0:1, :]                                                   # [1, KHL]
    nis = munis[1:2, :]                                                  # [1, KHL]
    tile = tile_ref[...].astype(jnp.float32)                             # [HL, KHL]  exact 0/1
    rlk = rlk_ref[...].astype(jnp.float32)                               # [KHL, KH]  exact 0/1
    rh = rh_ref[...].astype(jnp.float32)                                 # [KH, K]    exact 0/1
    w = w_ref[...]                                                       # [1, K]
    bias = b_ref[...]                                                    # [1, 1]

    cpad = cpad_ref[...]                                                 # [B, CL]
    hpad = hpad_ref[...]                                                 # [B, HL]
    invc = invc_ref[...]                                                 # [B, 1]

    # Block-diagonal candidate-token selector (batch independent):
    # blk[c, j] = True iff flattened token column j belongs to candidate c.
    col = lax.broadcasted_iota(jnp.int32, (CDD, CL), 1)
    row = lax.broadcasted_iota(jnp.int32, (CDD, CL), 0)
    off = col - row * SIG_LEN
    blk = jnp.logical_and(off >= 0, off < SIG_LEN)

    rows = []
    for b in range(BATCH):                                               # B=2, unrolled at trace time
        c_n = tok[b * CL:(b + 1) * CL, :]                                # [CL, D]
        h_n = tok[HIS_OFF + b * HL:HIS_OFF + (b + 1) * HL, :]            # [HL, D]

        # cosine-similarity matrix (MXU); padded history tokens -> sentinel so
        # the RBF contribution underflows to exactly 0 (== 0/1 mask multiply).
        m = lax.dot_general(c_n, h_n, (((1,), (1,)), ((), ())),
                            preferred_element_type=jnp.float32)          # [CL, HL]
        m = jnp.where(hpad[b:b + 1, :] > 0.5, m, _MASK_SENTINEL)

        # lane-dense RBF: replicate sim across the K kernels along lanes
        # ((k, h, lk) ordering), one exp on 100%-full vregs.
        m_b = jnp.dot(m, tile, preferred_element_type=jnp.float32)       # [CL, KHL]
        d = m_b - mu
        p = jnp.exp(d * d * nis)                                         # [CL, KHL]

        # sum over history tokens lk per (kernel, history item), then log-clamp
        ps = jnp.dot(p, rlk, preferred_element_type=jnp.float32)         # [CL, KH]
        lp = jnp.log(jnp.maximum(ps, 1e-10))

        # candidate-token mask * 0.01, sum over candidate tokens, sum over his items
        s_b = jnp.where(blk, cpad[b:b + 1, :] * 0.01, 0.0)               # [C, CL]
        pv = jnp.dot(jnp.dot(s_b, lp, preferred_element_type=jnp.float32),
                     rh, preferred_element_type=jnp.float32)             # [C, K]

        # fused epilogue: / his_mask_count, tanh, Linear(K -> 1), log_softmax over C
        pv = pv * invc[b:b + 1, :]
        t = jnp.tanh(pv)
        logit = lax.dot_general(w, t, (((1,), (1,)), ((), ())),
                                preferred_element_type=jnp.float32) + bias   # [1, C]
        mx = jnp.max(logit, axis=-1, keepdims=True)
        z = logit - mx
        lse = jnp.log(jnp.sum(jnp.exp(z), axis=-1, keepdims=True))
        rows.append(z - lse)

    out_ref[...] = jnp.concatenate(rows, axis=0)                         # [B, C]


def knrm_forward(params, candidate_title, clicked_title, candidate_pad, clicked_pad, his_mask):
    emb = params["embedding"].astype(jnp.float32)
    B, C, L = candidate_title.shape
    H = clicked_title.shape[1]
    K = KERNEL_NUM

    # token ids of the whole batch (candidates first, then history), flattened
    ids = jnp.concatenate(
        [candidate_title.reshape(B * C * L), clicked_title.reshape(B * H * L)]
    ).astype(jnp.int32).reshape(NTOK, 1)

    cpad = candidate_pad.astype(jnp.float32).reshape(B, C * L)
    hpad = clicked_pad.astype(jnp.float32).reshape(B, H * L)
    inv_cnt = (1.0 / (H - jnp.sum(his_mask, axis=-2))).astype(jnp.float32).reshape(B, 1)

    # constant tables, built host-side and passed as operands
    # (Pallas forbids captured array constants inside the kernel body)
    munis = jnp.asarray(np.stack([np.repeat(MUS, HL),
                                  np.repeat(-1.0 / (2.0 * SIGMAS ** 2), HL)]).astype(np.float32))
    tile_mat = jnp.asarray(np.tile(np.eye(HL, dtype=np.float32), (1, K)), dtype=jnp.bfloat16)
    red_lk = jnp.asarray(np.repeat(np.eye(KH, dtype=np.float32), SIG_LEN, axis=0),
                         dtype=jnp.bfloat16)
    red_h = jnp.asarray(np.repeat(np.eye(K, dtype=np.float32), HIS, axis=0), dtype=jnp.bfloat16)

    ltr_w = params["ltr_w"].astype(jnp.float32).reshape(1, K)
    ltr_b = params["ltr_b"].astype(jnp.float32).reshape(1, 1)

    return pl.pallas_call(
        _knrm_kernel,
        out_shape=jax.ShapeDtypeStruct((B, C), jnp.float32),
        grid_spec=pltpu.PrefetchScalarGridSpec(
            num_scalar_prefetch=0,
            grid=(1,),                                    # single step: whole problem fits VMEM
            in_specs=[
                pl.BlockSpec((VOCAB, EMB_DIM), lambda i: (0, 0)),   # embedding table
                pl.BlockSpec((NTOK, 1), lambda i: (0, 0)),          # token ids
                pl.BlockSpec((B, C * L), lambda i: (0, 0)),         # candidate token pad
                pl.BlockSpec((B, H * L), lambda i: (0, 0)),         # history token pad
                pl.BlockSpec((B, 1), lambda i: (0, 0)),             # 1 / his_mask_count
                pl.BlockSpec((2, KHL), lambda i: (0, 0)),           # mu / -1/(2 sigma^2)
                pl.BlockSpec((HL, KHL), lambda i: (0, 0)),          # lane-tiling matrix (bf16)
                pl.BlockSpec((KHL, KH), lambda i: (0, 0)),          # lk-reduction matrix (bf16)
                pl.BlockSpec((KH, K), lambda i: (0, 0)),            # h-reduction matrix (bf16)
                pl.BlockSpec((1, K), lambda i: (0, 0)),             # learningToRank weight
                pl.BlockSpec((1, 1), lambda i: (0, 0)),             # learningToRank bias
            ],
            out_specs=pl.BlockSpec((B, C), lambda i: (0, 0)),
        ),
        compiler_params=pltpu.CompilerParams(dimension_semantics=("arbitrary",)),
    )(emb, ids, cpad, hpad, inv_cnt, munis, tile_mat, red_lk, red_h, ltr_w, ltr_b)
    # TODO(synk): self.query / _scaled_dp_attention / _his_combine are never used by forward(), so omitted.


def knrm_reference(params, candidate_title, clicked_title, candidate_pad, clicked_pad, his_mask):
    """Pure-JAX mirror of the PyTorch forward (6-D broadcasting), for verification."""
    emb = params["embedding"]
    ce = emb[candidate_title]
    he = emb[clicked_title]
    cn = ce / jnp.maximum(jnp.linalg.norm(ce, axis=-1, keepdims=True), 1e-12)
    hn = he / jnp.maximum(jnp.linalg.norm(he, axis=-1, keepdims=True), 1e-12)
    fusion = jnp.einsum("bcqd,bhkd->bchqk", cn, hn,
                        precision=jax.lax.Precision.HIGHEST)[..., None]   # [B,C,H,L,L,1]
    mus = jnp.asarray(MUS).reshape(1, 1, 1, 1, 1, -1)
    sig = jnp.asarray(SIGMAS).reshape(1, 1, 1, 1, 1, -1)
    mask_cdd = candidate_pad.reshape(BATCH, CDD, 1, SIG_LEN, 1)
    mask_his = clicked_pad.reshape(BATCH, 1, HIS, 1, SIG_LEN, 1)
    pm = jnp.exp(-((fusion - mus) ** 2) / (2 * sig ** 2)) * mask_his
    ps = jnp.sum(pm, axis=-2)
    lp = jnp.log(jnp.maximum(ps, 1e-10)) * mask_cdd * 0.01
    pv = jnp.sum(lp, axis=-2)                                             # [B,C,H,K]
    cnt = (HIS - jnp.sum(his_mask, axis=-2)).reshape(-1, 1, 1)
    pvec = jnp.sum(pv, axis=-2) / cnt
    logits = jnp.einsum("bck,k->bc", jnp.tanh(pvec), params["ltr_w"][0],
                        precision=jax.lax.Precision.HIGHEST) + params["ltr_b"][0]
    return jax.nn.log_softmax(logits, axis=1)


if __name__ == "__main__":
    key = jax.random.PRNGKey(0)
    k_emb, k_cdd, k_his, k_w, k_b = jax.random.split(key, 5)

    params = {
        "embedding": jax.random.normal(k_emb, (VOCAB, EMB_DIM), jnp.float32),
        "ltr_w": jax.random.normal(k_w, (1, KERNEL_NUM), jnp.float32) / np.sqrt(KERNEL_NUM),
        "ltr_b": jax.random.normal(k_b, (1,), jnp.float32) * 0.1,
    }

    candidate_title = jax.random.randint(k_cdd, (BATCH, CDD, SIG_LEN), 0, VOCAB)
    clicked_title = jax.random.randint(k_his, (BATCH, HIS, SIG_LEN), 0, VOCAB)

    # deterministic padding masks: 1 for real tokens, 0 for pad
    cdd_lens = 3 + (jnp.arange(BATCH * CDD).reshape(BATCH, CDD) % (SIG_LEN - 3))
    candidate_pad = (jnp.arange(SIG_LEN)[None, None, :] < cdd_lens[..., None]).astype(jnp.float32)
    his_lens = 2 + (jnp.arange(BATCH * HIS).reshape(BATCH, HIS) % (SIG_LEN - 2))
    clicked_pad = (jnp.arange(SIG_LEN)[None, None, :] < his_lens[..., None]).astype(jnp.float32)

    # his_mask: [B, HIS, 1]; batch 0 has one masked history item, batch 1 none
    his_mask = (jnp.arange(HIS)[None, :, None]
                >= jnp.array([HIS - 1, HIS])[:, None, None]).astype(jnp.float32)

    score = jax.jit(knrm_forward)(params, candidate_title, clicked_title,
                                  candidate_pad, clicked_pad, his_mask)
    jax.block_until_ready(score)

    ref = knrm_reference(params, candidate_title, clicked_title,
                         candidate_pad, clicked_pad, his_mask)
    np.testing.assert_allclose(np.asarray(score), np.asarray(ref), rtol=1e-3, atol=1e-3)

    print("KERNEL_OK")
</pallas_src>

<mosaic_0001>
module attributes {stable_mosaic.version = 11 : i64} {
  func.func @_knrm_kernel(%arg0: i32, %arg1: memref<100x32xf32, #tpu.memory_space<vmem>>, %arg2: memref<144x1xi32, #tpu.memory_space<vmem>>, %arg3: memref<2x40xf32, #tpu.memory_space<vmem>>, %arg4: memref<2x32xf32, #tpu.memory_space<vmem>>, %arg5: memref<2x1xf32, #tpu.memory_space<vmem>>, %arg6: memref<2x640xf32, #tpu.memory_space<vmem>>, %arg7: memref<32x640xbf16, #tpu.memory_space<vmem>>, %arg8: memref<640x80xbf16, #tpu.memory_space<vmem>>, %arg9: memref<80x20xbf16, #tpu.memory_space<vmem>>, %arg10: memref<1x20xf32, #tpu.memory_space<vmem>>, %arg11: memref<1x1xf32, #tpu.memory_space<vmem>>, %arg12: memref<2x5xf32, #tpu.memory_space<vmem>>) attributes {dimension_semantics = [#tpu.dimension_semantics<arbitrary>], iteration_bounds = array<i64: 1>, scalar_prefetch = 0 : i64, scratch_operands = 0 : i64, tpu.core_type = #tpu.core_type<tc>, window_params = [{pipeline_mode = #tpu.pipeline_mode<synchronous>, transform_indices = @transform_0, window_bounds = array<i64: 100, 32>}, {pipeline_mode = #tpu.pipeline_mode<synchronous>, transform_indices = @transform_1, window_bounds = array<i64: 144, 1>}, {pipeline_mode = #tpu.pipeline_mode<synchronous>, transform_indices = @transform_2, window_bounds = array<i64: 2, 40>}, {pipeline_mode = #tpu.pipeline_mode<synchronous>, transform_indices = @transform_3, window_bounds = array<i64: 2, 32>}, {pipeline_mode = #tpu.pipeline_mode<synchronous>, transform_indices = @transform_4, window_bounds = array<i64: 2, 1>}, {pipeline_mode = #tpu.pipeline_mode<synchronous>, transform_indices = @transform_5, window_bounds = array<i64: 2, 640>}, {pipeline_mode = #tpu.pipeline_mode<synchronous>, transform_indices = @transform_6, window_bounds = array<i64: 32, 640>}, {pipeline_mode = #tpu.pipeline_mode<synchronous>, transform_indices = @transform_7, window_bounds = array<i64: 640, 80>}, {pipeline_mode = #tpu.pipeline_mode<synchronous>, transform_indices = @transform_8, window_bounds = array<i64: 80, 20>}, {pipeline_mode = #tpu.pipeline_mode<synchronous>, transform_indices = @transform_9, window_bounds = array<i64: 1, 20>}, {pipeline_mode = #tpu.pipeline_mode<synchronous>, transform_indices = @transform_10, window_bounds = array<i64: 1, 1>}, {pipeline_mode = #tpu.pipeline_mode<synchronous>, transform_indices = @transform_11, window_bounds = array<i64: 2, 5>}]} {
    %c0 = arith.constant 0 : index
    %c0_0 = arith.constant 0 : index
    %0 = vector.load %arg1[%c0, %c0_0] : memref<100x32xf32, #tpu.memory_space<vmem>>, vector<100x32xf32>
    %1 = arith.mulf %0, %0 : vector<100x32xf32>
    %cst = arith.constant dense<0.000000e+00> : vector<100xf32>
    %2 = vector.multi_reduction <add>, %1, %cst [1] : vector<100x32xf32> to vector<100xf32>
    %3 = vector.shape_cast %2 : vector<100xf32> to vector<100x1xf32>
    %cst_1 = arith.constant 1.000000e-24 : f32
    %4 = vector.broadcast %cst_1 : f32 to vector<100x1xf32>
    %5 = arith.maximumf %3, %4 : vector<100x1xf32>
    %6 = math.rsqrt %5 : vector<100x1xf32>
    %7 = vector.broadcast %6 : vector<100x1xf32> to vector<100x32xf32>
    %8 = arith.mulf %0, %7 : vector<100x32xf32>
    %c0_2 = arith.constant 0 : index
    %c0_3 = arith.constant 0 : index
    %9 = vector.load %arg2[%c0_2, %c0_3] : memref<144x1xi32, #tpu.memory_space<vmem>>, vector<144x1xi32>
    %10 = tpu.iota {dimensions = array<i32: 1>} : vector<144x100xi32>
    %11 = vector.broadcast %9 : vector<144x1xi32> to vector<144x100xi32>
    %12 = arith.cmpi eq, %11, %10 : vector<144x100xi32>
    %13 = arith.extui %12 : vector<144x100xi1> to vector<144x100xi32>
    %14 = arith.sitofp %13 : vector<144x100xi32> to vector<144x100xf32>
    %cst_4 = arith.constant dense<0.000000e+00> : vector<144x32xf32>
    %15 = tpu.matmul %14, %8, %cst_4 {dimension_numbers = #tpu.dot_dimension_numbers<[1], [0], [0], [1], [0, 0, 1, 1], [], []>} : vector<144x100xf32>, vector<100x32xf32>, vector<144x32xf32> -> vector<144x32xf32>
    %c0_5 = arith.constant 0 : index
    %c0_6 = arith.constant 0 : index
    %16 = vector.load %arg6[%c0_5, %c0_6] : memref<2x640xf32, #tpu.memory_space<vmem>>, vector<2x640xf32>
    %17 = vector.extract_strided_slice %16 {offsets = [0, 0], sizes = [1, 640], strides = [1, 1]} : vector<2x640xf32> to vector<1x640xf32>
    %18 = vector.extract_strided_slice %16 {offsets = [1, 0], sizes = [1, 640], strides = [1, 1]} : vector<2x640xf32> to vector<1x640xf32>
    %c0_7 = arith.constant 0 : index
    %c0_8 = arith.constant 0 : index
    %19 = vector.load %arg7[%c0_7, %c0_8] : memref<32x640xbf16, #tpu.memory_space<vmem>>, vector<32x640xbf16>
    %20 = arith.extf %19 : vector<32x640xbf16> to vector<32x640xf32>
    %c0_9 = arith.constant 0 : index
    %c0_10 = arith.constant 0 : index
    %21 = vector.load %arg8[%c0_9, %c0_10] : memref<640x80xbf16, #tpu.memory_space<vmem>>, vector<640x80xbf16>
    %22 = arith.extf %21 : vector<640x80xbf16> to vector<640x80xf32>
    %c0_11 = arith.constant 0 : index
    %c0_12 = arith.constant 0 : index
    %23 = vector.load %arg9[%c0_11, %c0_12] : memref<80x20xbf16, #tpu.memory_space<vmem>>, vector<80x20xbf16>
    %24 = arith.extf %23 : vector<80x20xbf16> to vector<80x20xf32>
    %c0_13 = arith.constant 0 : index
    %c0_14 = arith.constant 0 : index
    %25 = vector.load %arg10[%c0_13, %c0_14] : memref<1x20xf32, #tpu.memory_space<vmem>>, vector<1x20xf32>
    %c0_15 = arith.constant 0 : index
    %c0_16 = arith.constant 0 : index
    %26 = vector.load %arg11[%c0_15, %c0_16] : memref<1x1xf32, #tpu.memory_space<vmem>>, vector<1x1xf32>
    %c0_17 = arith.constant 0 : index
    %c0_18 = arith.constant 0 : index
    %27 = vector.load %arg3[%c0_17, %c0_18] : memref<2x40xf32, #tpu.memory_space<vmem>>, vector<2x40xf32>
    %c0_19 = arith.constant 0 : index
    %c0_20 = arith.constant 0 : index
    %28 = vector.load %arg4[%c0_19, %c0_20] : memref<2x32xf32, #tpu.memory_space<vmem>>, vector<2x32xf32>
    %c0_21 = arith.constant 0 : index
    %c0_22 = arith.constant 0 : index
    %29 = vector.load %arg5[%c0_21, %c0_22] : memref<2x1xf32, #tpu.memory_space<vmem>>, vector<2x1xf32>
    %30 = tpu.iota {dimensions = array<i32: 1>} : vector<5x40xi32>
    %31 = tpu.iota {dimensions = array<i32: 0>} : vector<5x40xi32>
    %c8_i32 = arith.constant 8 : i32
    %32 = vector.broadcast %c8_i32 : i32 to vector<5x40xi32>
    %33 = arith.muli %31, %32 : vector<5x40xi32>
    %34 = arith.subi %30, %33 : vector<5x40xi32>
    %c0_i32 = arith.constant 0 : i32
    %35 = vector.broadcast %c0_i32 : i32 to vector<5x40xi32>
    %36 = arith.cmpi sge, %34, %35 : vector<5x40xi32>
    %c8_i32_23 = arith.constant 8 : i32
    %37 = vector.broadcast %c8_i32_23 : i32 to vector<5x40xi32>
    %38 = arith.cmpi slt, %34, %37 : vector<5x40xi32>
    %39 = arith.andi %36, %38 : vector<5x40xi1>
    %40 = vector.extract_strided_slice %15 {offsets = [0, 0], sizes = [40, 32], strides = [1, 1]} : vector<144x32xf32> to vector<40x32xf32>
    %41 = vector.extract_strided_slice %15 {offsets = [80, 0], sizes = [32, 32], strides = [1, 1]} : vector<144x32xf32> to vector<32x32xf32>
    %cst_24 = arith.constant dense<0.000000e+00> : vector<40x32xf32>
    %42 = tpu.matmul %40, %41, %cst_24 {dimension_numbers = #tpu.dot_dimension_numbers<[1], [1], [0], [0], [0, 0, 1, 0], [], []>} : vector<40x32xf32>, vector<32x32xf32>, vector<40x32xf32> -> vector<40x32xf32>
    %43 = vector.extract_strided_slice %28 {offsets = [0, 0], sizes = [1, 32], strides = [1, 1]} : vector<2x32xf32> to vector<1x32xf32>
    %cst_25 = arith.constant 5.000000e-01 : f32
    %44 = vector.broadcast %cst_25 : f32 to vector<1x32xf32>
    %45 = arith.cmpf ogt, %43, %44 : vector<1x32xf32>
    %cst_26 = arith.constant 1.000000e+04 : f32
    %46 = vector.shape_cast %45 : vector<1x32xi1> to vector<1x32xi1>
    %47 = vector.broadcast %46 : vector<1x32xi1> to vector<40x32xi1>
    %48 = vector.broadcast %cst_26 : f32 to vector<40x32xf32>
    %49 = arith.select %47, %42, %48 : vector<40x32xi1>, vector<40x32xf32>
    %cst_27 = arith.constant dense<0.000000e+00> : vector<40x640xf32>
    %50 = tpu.matmul %49, %20, %cst_27 {dimension_numbers = #tpu.dot_dimension_numbers<[1], [0], [0], [1], [0, 0, 1, 1], [], []>} : vector<40x32xf32>, vector<32x640xf32>, vector<40x640xf32> -> vector<40x640xf32>
    %51 = vector.broadcast %17 : vector<1x640xf32> to vector<40x640xf32>
    %52 = arith.subf %50, %51 : vector<40x640xf32>
    %53 = arith.mulf %52, %52 : vector<40x640xf32>
    %54 = vector.broadcast %18 : vector<1x640xf32> to vector<40x640xf32>
    %55 = arith.mulf %53, %54 : vector<40x640xf32>
    %56 = math.exp %55 : vector<40x640xf32>
    %cst_28 = arith.constant dense<0.000000e+00> : vector<40x80xf32>
    %57 = tpu.matmul %56, %22, %cst_28 {dimension_numbers = #tpu.dot_dimension_numbers<[1], [0], [0], [1], [0, 0, 1, 1], [], []>} : vector<40x640xf32>, vector<640x80xf32>, vector<40x80xf32> -> vector<40x80xf32>
    %cst_29 = arith.constant 1.000000e-10 : f32
    %58 = vector.broadcast %cst_29 : f32 to vector<40x80xf32>
    %59 = arith.maximumf %57, %58 : vector<40x80xf32>
    %60 = math.log %59 : vector<40x80xf32>
    %61 = vector.extract_strided_slice %27 {offsets = [0, 0], sizes = [1, 40], strides = [1, 1]} : vector<2x40xf32> to vector<1x40xf32>
    %cst_30 = arith.constant 0.00999999977 : f32
    %62 = vector.broadcast %cst_30 : f32 to vector<1x40xf32>
    %63 = arith.mulf %61, %62 : vector<1x40xf32>
    %cst_31 = arith.constant 0.000000e+00 : f32
    %64 = vector.shape_cast %63 : vector<1x40xf32> to vector<1x40xf32>
    %65 = vector.broadcast %64 : vector<1x40xf32> to vector<5x40xf32>
    %66 = vector.broadcast %cst_31 : f32 to vector<5x40xf32>
    %67 = arith.select %39, %65, %66 : vector<5x40xi1>, vector<5x40xf32>
    %cst_32 = arith.constant dense<0.000000e+00> : vector<5x80xf32>
    %68 = tpu.matmul %67, %60, %cst_32 {dimension_numbers = #tpu.dot_dimension_numbers<[1], [0], [0], [1], [0, 0, 1, 1], [], []>} : vector<5x40xf32>, vector<40x80xf32>, vector<5x80xf32> -> vector<5x80xf32>
    %cst_33 = arith.constant dense<0.000000e+00> : vector<5x20xf32>
    %69 = tpu.matmul %68, %24, %cst_33 {dimension_numbers = #tpu.dot_dimension_numbers<[1], [0], [0], [1], [0, 0, 1, 1], [], []>} : vector<5x80xf32>, vector<80x20xf32>, vector<5x20xf32> -> vector<5x20xf32>
    %70 = vector.extract_strided_slice %29 {offsets = [0, 0], sizes = [1, 1], strides = [1, 1]} : vector<2x1xf32> to vector<1x1xf32>
    %71 = vector.broadcast %70 : vector<1x1xf32> to vector<5x20xf32>
    %72 = arith.mulf %69, %71 : vector<5x20xf32>
    %73 = math.tanh %72 : vector<5x20xf32>
    %cst_34 = arith.constant dense<0.000000e+00> : vector<1x5xf32>
    %74 = tpu.matmul %25, %73, %cst_34 {dimension_numbers = #tpu.dot_dimension_numbers<[1], [1], [0], [0], [0, 0, 1, 0], [], []>} : vector<1x20xf32>, vector<5x20xf32>, vector<1x5xf32> -> vector<1x5xf32>
    %75 = vector.broadcast %26 : vector<1x1xf32> to vector<1x5xf32>
    %76 = arith.addf %74, %75 : vector<1x5xf32>
    %cst_35 = arith.constant dense<0xFF800000> : vector<1xf32>
    %77 = vector.multi_reduction <maximumf>, %76, %cst_35 [1] : vector<1x5xf32> to vector<1xf32>
    %78 = vector.shape_cast %77 : vector<1xf32> to vector<1x1xf32>
    %79 = vector.broadcast %78 : vector<1x1xf32> to vector<1x5xf32>
    %80 = arith.subf %76, %79 : vector<1x5xf32>
    %81 = math.exp %80 : vector<1x5xf32>
    %cst_36 = arith.constant dense<0.000000e+00> : vector<1xf32>
    %82 = vector.multi_reduction <add>, %81, %cst_36 [1] : vector<1x5xf32> to vector<1xf32>
    %83 = vector.shape_cast %82 : vector<1xf32> to vector<1x1xf32>
    %84 = math.log %83 : vector<1x1xf32>
    %85 = vector.broadcast %84 : vector<1x1xf32> to vector<1x5xf32>
    %86 = arith.subf %80, %85 : vector<1x5xf32>
    %87 = vector.extract_strided_slice %15 {offsets = [40, 0], sizes = [40, 32], strides = [1, 1]} : vector<144x32xf32> to vector<40x32xf32>
    %88 = vector.extract_strided_slice %15 {offsets = [112, 0], sizes = [32, 32], strides = [1, 1]} : vector<144x32xf32> to vector<32x32xf32>
    %cst_37 = arith.constant dense<0.000000e+00> : vector<40x32xf32>
    %89 = tpu.matmul %87, %88, %cst_37 {dimension_numbers = #tpu.dot_dimension_numbers<[1], [1], [0], [0], [0, 0, 1, 0], [], []>} : vector<40x32xf32>, vector<32x32xf32>, vector<40x32xf32> -> vector<40x32xf32>
    %90 = vector.extract_strided_slice %28 {offsets = [1, 0], sizes = [1, 32], strides = [1, 1]} : vector<2x32xf32> to vector<1x32xf32>
    %cst_38 = arith.constant 5.000000e-01 : f32
    %91 = vector.broadcast %cst_38 : f32 to vector<1x32xf32>
    %92 = arith.cmpf ogt, %90, %91 : vector<1x32xf32>
    %cst_39 = arith.constant 1.000000e+04 : f32
    %93 = vector.shape_cast %92 : vector<1x32xi1> to vector<1x32xi1>
    %94 = vector.broadcast %93 : vector<1x32xi1> to vector<40x32xi1>
    %95 = vector.broadcast %cst_39 : f32 to vector<40x32xf32>
    %96 = arith.select %94, %89, %95 : vector<40x32xi1>, vector<40x32xf32>
    %cst_40 = arith.constant dense<0.000000e+00> : vector<40x640xf32>
    %97 = tpu.matmul %96, %20, %cst_40 {dimension_numbers = #tpu.dot_dimension_numbers<[1], [0], [0], [1], [0, 0, 1, 1], [], []>} : vector<40x32xf32>, vector<32x640xf32>, vector<40x640xf32> -> vector<40x640xf32>
    %98 = vector.broadcast %17 : vector<1x640xf32> to vector<40x640xf32>
    %99 = arith.subf %97, %98 : vector<40x640xf32>
    %100 = arith.mulf %99, %99 : vector<40x640xf32>
    %101 = vector.broadcast %18 : vector<1x640xf32> to vector<40x640xf32>
    %102 = arith.mulf %100, %101 : vector<40x640xf32>
    %103 = math.exp %102 : vector<40x640xf32>
    %cst_41 = arith.constant dense<0.000000e+00> : vector<40x80xf32>
    %104 = tpu.matmul %103, %22, %cst_41 {dimension_numbers = #tpu.dot_dimension_numbers<[1], [0], [0], [1], [0, 0, 1, 1], [], []>} : vector<40x640xf32>, vector<640x80xf32>, vector<40x80xf32> -> vector<40x80xf32>
    %cst_42 = arith.constant 1.000000e-10 : f32
    %105 = vector.broadcast %cst_42 : f32 to vector<40x80xf32>
    %106 = arith.maximumf %104, %105 : vector<40x80xf32>
    %107 = math.log %106 : vector<40x80xf32>
    %108 = vector.extract_strided_slice %27 {offsets = [1, 0], sizes = [1, 40], strides = [1, 1]} : vector<2x40xf32> to vector<1x40xf32>
    %cst_43 = arith.constant 0.00999999977 : f32
    %109 = vector.broadcast %cst_43 : f32 to vector<1x40xf32>
    %110 = arith.mulf %108, %109 : vector<1x40xf32>
    %cst_44 = arith.constant 0.000000e+00 : f32
    %111 = vector.shape_cast %110 : vector<1x40xf32> to vector<1x40xf32>
    %112 = vector.broadcast %111 : vector<1x40xf32> to vector<5x40xf32>
    %113 = vector.broadcast %cst_44 : f32 to vector<5x40xf32>
    %114 = arith.select %39, %112, %113 : vector<5x40xi1>, vector<5x40xf32>
    %cst_45 = arith.constant dense<0.000000e+00> : vector<5x80xf32>
    %115 = tpu.matmul %114, %107, %cst_45 {dimension_numbers = #tpu.dot_dimension_numbers<[1], [0], [0], [1], [0, 0, 1, 1], [], []>} : vector<5x40xf32>, vector<40x80xf32>, vector<5x80xf32> -> vector<5x80xf32>
    %cst_46 = arith.constant dense<0.000000e+00> : vector<5x20xf32>
    %116 = tpu.matmul %115, %24, %cst_46 {dimension_numbers = #tpu.dot_dimension_numbers<[1], [0], [0], [1], [0, 0, 1, 1], [], []>} : vector<5x80xf32>, vector<80x20xf32>, vector<5x20xf32> -> vector<5x20xf32>
    %117 = vector.extract_strided_slice %29 {offsets = [1, 0], sizes = [1, 1], strides = [1, 1]} : vector<2x1xf32> to vector<1x1xf32>
    %118 = vector.broadcast %117 : vector<1x1xf32> to vector<5x20xf32>
    %119 = arith.mulf %116, %118 : vector<5x20xf32>
    %120 = math.tanh %119 : vector<5x20xf32>
    %cst_47 = arith.constant dense<0.000000e+00> : vector<1x5xf32>
    %121 = tpu.matmul %25, %120, %cst_47 {dimension_numbers = #tpu.dot_dimension_numbers<[1], [1], [0], [0], [0, 0, 1, 0], [], []>} : vector<1x20xf32>, vector<5x20xf32>, vector<1x5xf32> -> vector<1x5xf32>
    %122 = vector.broadcast %26 : vector<1x1xf32> to vector<1x5xf32>
    %123 = arith.addf %121, %122 : vector<1x5xf32>
    %cst_48 = arith.constant dense<0xFF800000> : vector<1xf32>
    %124 = vector.multi_reduction <maximumf>, %123, %cst_48 [1] : vector<1x5xf32> to vector<1xf32>
    %125 = vector.shape_cast %124 : vector<1xf32> to vector<1x1xf32>
    %126 = vector.broadcast %125 : vector<1x1xf32> to vector<1x5xf32>
    %127 = arith.subf %123, %126 : vector<1x5xf32>
    %128 = math.exp %127 : vector<1x5xf32>
    %cst_49 = arith.constant dense<0.000000e+00> : vector<1xf32>
    %129 = vector.multi_reduction <add>, %128, %cst_49 [1] : vector<1x5xf32> to vector<1xf32>
    %130 = vector.shape_cast %129 : vector<1xf32> to vector<1x1xf32>
    %131 = math.log %130 : vector<1x1xf32>
    %132 = vector.broadcast %131 : vector<1x1xf32> to vector<1x5xf32>
    %133 = arith.subf %127, %132 : vector<1x5xf32>
    %134 = tpu.concatenate %86, %133 in 0 : vector<1x5xf32>, vector<1x5xf32> -> vector<2x5xf32>
    %c0_50 = arith.constant 0 : index
    %c0_51 = arith.constant 0 : index
    %135 = vector.load %arg12[%c0_50, %c0_51] : memref<2x5xf32, #tpu.memory_space<vmem>>, vector<2x5xf32>
    tpu.vector_store %arg12[%c0_50, %c0_51], %134 {strides = array<i32>} : memref<2x5xf32, #tpu.memory_space<vmem>>, vector<2x5xf32>,
    return
  }
  func.func @transform_0(%arg0: i32) -> (i32, i32) {
    %c0_i32 = arith.constant 0 : i32
    %c0_i32_0 = arith.constant 0 : i32
    %c0_i32_1 = arith.constant 0 : i32
    return %c0_i32, %c0_i32_0 : i32, i32
  }
  func.func @transform_1(%arg0: i32) -> (i32, i32) {
    %c0_i32 = arith.constant 0 : i32
    %c0_i32_0 = arith.constant 0 : i32
    %c0_i32_1 = arith.constant 0 : i32
    return %c0_i32, %c0_i32_0 : i32, i32
  }
  func.func @transform_2(%arg0: i32) -> (i32, i32) {
    %c0_i32 = arith.constant 0 : i32
    %c0_i32_0 = arith.constant 0 : i32
    %c0_i32_1 = arith.constant 0 : i32
    return %c0_i32, %c0_i32_0 : i32, i32
  }
  func.func @transform_3(%arg0: i32) -> (i32, i32) {
    %c0_i32 = arith.constant 0 : i32
    %c0_i32_0 = arith.constant 0 : i32
    %c0_i32_1 = arith.constant 0 : i32
    return %c0_i32, %c0_i32_0 : i32, i32
  }
  func.func @transform_4(%arg0: i32) -> (i32, i32) {
    %c0_i32 = arith.constant 0 : i32
    %c0_i32_0 = arith.constant 0 : i32
    %c0_i32_1 = arith.constant 0 : i32
    return %c0_i32, %c0_i32_0 : i32, i32
  }
  func.func @transform_5(%arg0: i32) -> (i32, i32) {
    %c0_i32 = arith.constant 0 : i32
    %c0_i32_0 = arith.constant 0 : i32
    %c0_i32_1 = arith.constant 0 : i32
    return %c0_i32, %c0_i32_0 : i32, i32
  }
  func.func @transform_6(%arg0: i32) -> (i32, i32) {
    %c0_i32 = arith.constant 0 : i32
    %c0_i32_0 = arith.constant 0 : i32
    %c0_i32_1 = arith.constant 0 : i32
    return %c0_i32, %c0_i32_0 : i32, i32
  }
  func.func @transform_7(%arg0: i32) -> (i32, i32) {
    %c0_i32 = arith.constant 0 : i32
    %c0_i32_0 = arith.constant 0 : i32
    %c0_i32_1 = arith.constant 0 : i32
    return %c0_i32, %c0_i32_0 : i32, i32
  }
  func.func @transform_8(%arg0: i32) -> (i32, i32) {
    %c0_i32 = arith.constant 0 : i32
    %c0_i32_0 = arith.constant 0 : i32
    %c0_i32_1 = arith.constant 0 : i32
    return %c0_i32, %c0_i32_0 : i32, i32
  }
  func.func @transform_9(%arg0: i32) -> (i32, i32) {
    %c0_i32 = arith.constant 0 : i32
    %c0_i32_0 = arith.constant 0 : i32
    %c0_i32_1 = arith.constant 0 : i32
    return %c0_i32, %c0_i32_0 : i32, i32
  }
  func.func @transform_10(%arg0: i32) -> (i32, i32) {
    %c0_i32 = arith.constant 0 : i32
    %c0_i32_0 = arith.constant 0 : i32
    %c0_i32_1 = arith.constant 0 : i32
    return %c0_i32, %c0_i32_0 : i32, i32
  }
  func.func @transform_11(%arg0: i32) -> (i32, i32) {
    %c0_i32 = arith.constant 0 : i32
    %c0_i32_0 = arith.constant 0 : i32
    %c0_i32_1 = arith.constant 0 : i32
    return %c0_i32, %c0_i32_0 : i32, i32
  }
}

</mosaic_0001>

<bundles_post_ra>
// kernel: knrm_forward.1
= control target key start
LH: loop header
LB: loop body
LE: loop exit
PB: predicated region body
PF: predicated region fallthrough
CT: control target
= control target key end

     0   :  { %s5739_s0 = inlined_call_operand.vmem [shape: f32[100,32], index: 0, kind: input, shape index: {}]   ;;  %s5740_s1 = inlined_call_operand.vmem [shape: s32[144,1], index: 1, kind: input, shape index: {}]   ;;  %s5741_s2 = inlined_call_operand.vmem [shape: f32[2,40], index: 2, kind: input, shape index: {}]   ;;  %s5742_s3 = inlined_call_operand.vmem [shape: f32[2,32], index: 3, kind: input, shape index: {}]   ;;  %s5743_s4 = inlined_call_operand.vmem [shape: f32[2,1], index: 4, kind: input, shape index: {}]   ;;  %s5744_s5 = inlined_call_operand.vmem [shape: f32[2,640], index: 5, kind: input, shape index: {}]   ;;  %s5745_s6 = inlined_call_operand.vmem [shape: bf16[32,640], index: 6, kind: input, shape index: {}]   ;;  %s5746_s7 = inlined_call_operand.vmem [shape: bf16[640,80], index: 7, kind: input, shape index: {}]   ;;  %s5747_s8 = inlined_call_operand.vmem [shape: bf16[80,20], index: 8, kind: input, shape index: {}]   ;;  %s5748_s9 = inlined_call_operand.vmem [shape: f32[1,20], index: 9, kind: input, shape index: {}]   ;;  %s5749_s10 = inlined_call_operand.<no memory space> [shape: f32[1,1], index: 10, kind: input, shape index: {}]   ;;  %s5750_s11 = inlined_call_operand.hbm [shape: f32[2,5], index: 11, kind: output, shape index: {}]  }
   0x1   :  { %v16_v0 = vstv %s5749_s10 }
   0x2   :  { %17 = vst [vmem:[#allocation2] sm:$0x1] %v16_v0 }
   0x3   :  { %v4593_v1 = vld [vmem:[%s5739_s0 + $0x10] sm:$0xff]  ;;  %vm67_vm0 = vcmask 261120   ;;  %v4598_v2 = vld [vmem:[%s5739_s0] sm:$0xff]  ;;  %v4603_v3 = vld [vmem:[%s5739_s0 + $0x18] sm:$0xff]  ;;  %v4522_v8 = vmov 0  }
   0x4   :  { %v56_v4 = vmul.f32 %v4593_v1, %v4593_v1  ;;  %v54_v5 = vmul.f32 %v4598_v2, %v4598_v2  ;;  %v57_v6 = vmul.f32 %v4603_v3, %v4603_v3  ;;  %v4614_v7 = vld [vmem:[%s5739_s0 + $0x8] sm:$0xff]  ;;  %4298 = vset.pattern.permute.xlu1 %v4522_v8  ;;  %4299 = vset.pattern.permute.xlu0 %v4522_v8  ;;  %v4628_v11 = vld [vmem:[%s5739_s0 + $0x20] sm:$0xff]  ;;  %v4641_v18 = vld [vmem:[%s5739_s0 + $0x38] sm:$0xff] }
   0x5   :  { %v55_v9 = vmul.f32 %v4614_v7, %v4614_v7  ;;  %v4623_v10 = vld [vmem:[%s5739_s0 + $0x28] sm:$0xff]  ;;  %v58_v17 = vmul.f32 %v4628_v11, %v4628_v11  ;;  %v4646_v19 = vld [vmem:[%s5739_s0 + $0x30] sm:$0xff]  ;;  %v61_v22 = vmul.f32 %v4641_v18, %v4641_v18  ;;  %v4662_v25 = vld [vmem:[%s5739_s0 + $0x40] sm:$0xff] }
   0x6   :  { %v74_v12 = vsel %vm67_vm0, %v56_v4, 0.0  ;;  %v68_v13 = vsel %vm67_vm0, %v54_v5, 0.0  ;;  %v77_v14 = vsel %vm67_vm0, %v57_v6, 0.0  ;;  %v59_v16 = vmul.f32 %v4623_v10, %v4623_v10  ;;  %v4657_v24 = vld [vmem:[%s5739_s0 + $0x48] sm:$0xff]  ;;  %v4667_v26 = vld [vmem:[%s5739_s0 + $0x58] sm:$0xff]  ;;  %v4672_v27 = vld [vmem:[%s5739_s0 + $0x50] sm:$0xff] }
   0x7   :  { %75 = vadd.xlane.f32.xlu1 %v74_v12  ;;  %69 = vadd.xlane.f32.xlu0 %v68_v13  ;;  %v71_v15 = vsel %vm67_vm0, %v55_v9, 0.0  ;;  %v80_v21 = vsel %vm67_vm0, %v58_v17, 0.0  ;;  %v60_v23 = vmul.f32 %v4646_v19, %v4646_v19  ;;  %v89_v28 = vsel %vm67_vm0, %v61_v22, 0.0 }
   0x8   :  { %v83_v20 = vsel %vm67_vm0, %v59_v16, 0.0  ;;  %v63_v30 = vmul.f32 %v4657_v24, %v4657_v24  ;;  %v62_v31 = vmul.f32 %v4662_v25, %v4662_v25 }
   0x9   :  { %v86_v29 = vsel %vm67_vm0, %v60_v23, 0.0 }
   0xb   :  { %78 = vadd.xlane.f32.xlu1 %v77_v14  ;;  %72 = vadd.xlane.f32.xlu0 %v71_v15 }
   0xf   :  { %84 = vadd.xlane.f32.xlu1 %v83_v20  ;;  %81 = vadd.xlane.f32.xlu0 %v80_v21 }
  0x13   :  { %90 = vadd.xlane.f32.xlu1 %v89_v28  ;;  %87 = vadd.xlane.f32.xlu0 %v86_v29 }
  0x14   :  { %18 = vsyncpa [#allocation4], 0  ;;  %v95_v32 = vsel %vm67_vm0, %v63_v30, 0.0  ;;  %v92_v33 = vsel %vm67_vm0, %v62_v31, 0.0  ;;  %v65_v34 = vmul.f32 %v4667_v26, %v4667_v26  ;;  %v64_v35 = vmul.f32 %v4672_v27, %v4672_v27  ;;  %v4689_v36 = vld [vmem:[%s5739_s0 + $0x60] sm:$0xf] }
  0x15   :  { %v66_v39 = vmul.f32 %v4689_v36, %v4689_v36  ;;  %vm104_vm1 = vcmask 257024   ;;  %v147_v41 = vld [vmem:[%s5740_s1] sm:$0xff]  ;;  %v149_v42 = vld [vmem:[%s5740_s1 + $0x10] sm:$0xff]  ;;  %v150_v43 = vld [vmem:[%s5740_s1 + $0x18] sm:$0xff]  ;;  %v165_v30 = vlaneseq  ;;  %vm275_vm2 = vcmask 818176   ;;  %s4526_s18 = smov [#allocation3]  }
  0x16   :  { %v101_v37 = vsel %vm67_vm0, %v65_v34, 0.0  ;;  %v98_v38 = vsel %vm67_vm0, %v64_v35, 0.0  ;;  %v148_v44 = vld [vmem:[%s5740_s1 + $0x8] sm:$0xff]  ;;  %v151_v45 = vld [vmem:[%s5740_s1 + $0x20] sm:$0xff]  ;;  %v157_v46 = vld [vmem:[%s5740_s1 + $0x50] sm:$0xff]  ;;  %vm330_vm4 = vcmask 1043456  }
  0x17   :  { %96 = vadd.xlane.f32.xlu1 %v95_v32  ;;  %93 = vadd.xlane.f32.xlu0 %v92_v33  ;;  %v105_v40 = vsel %vm104_vm1, %v66_v39, 0.0  ;;  %v152_v47 = vld [vmem:[%s5740_s1 + $0x28] sm:$0xff]  ;;  %v159_v48 = vld [vmem:[%s5740_s1 + $0x60] sm:$0xff]  ;;  %v153_v49 = vld [vmem:[%s5740_s1 + $0x30] sm:$0xff] }
  0x18   :  { %v161_v50 = vld [vmem:[%s5740_s1 + $0x70] sm:$0xff]  ;;  %v154_v51 = vld [vmem:[%s5740_s1 + $0x38] sm:$0xff]  ;;  %v163_v52 = vld [vmem:[%s5740_s1 + $0x80] sm:$0xff] }
  0x19   :  { %v155_v53 = vld [vmem:[%s5740_s1 + $0x40] sm:$0xff]  ;;  %v156_v55 = vld [vmem:[%s5740_s1 + $0x48] sm:$0xff]  ;;  %v158_v56 = vld [vmem:[%s5740_s1 + $0x58] sm:$0xff] }
  0x1a   :  { %v704_v54 = vld [vmem:[#allocation2] sm:$0x1]  ;;  %v160_v57 = vld [vmem:[%s5740_s1 + $0x68] sm:$0xff]  ;;  %v162_v58 = vld [vmem:[%s5740_s1 + $0x78] sm:$0xff] }
  0x1b   :  { %102 = vadd.xlane.f32.xlu1 %v101_v37  ;;  %99 = vadd.xlane.f32.xlu0 %v98_v38  ;;  %v164_v59 = vld [vmem:[%s5740_s1 + $0x88] sm:$0xff]  ;;  %s2987_s1 = sshll.u32 %s4526_s18, 4  ;;  %s2988_s1 = int_to_ptr.vmem [resolvable:$true] %s2987_s1 }
  0x1c   :  { %s4498_s19 = scalar_lea.vmem %s2988_s1, 32  ;;  %p4503_p1 = scmp.lt.s32.totalorder %s2988_s1, %s2988_s1 }
  0x1d   :  { %p4499_p0 = scmp.ne.s32.totalorder %s2988_s1, %s4498_s19  ;;  %p4504_p2 = scmp.lt.s32.totalorder %s4498_s19, %s4498_s19 }
  0x1f   :  { %106 = vadd.xlane.f32.xlu0 %v105_v40  ;;  %p4505_p3 = por %p4504_p2, %p4503_p1 }
  0x21   :  { %p4506_p4 = pnand %p4505_p3, %p4499_p0 }
  0x2c   :  { %168 = vperm.xlu1 %4298, %v147_v41  }
  0x30   :  { %174 = vperm.xlu1 %4298, %v149_v42  }
  0x34   :  { %177 = vperm.xlu1 %4298, %v150_v43  }
  0x35   :  { %171 = vperm.xlu0 %4299, %v148_v44   ;;  %v4754_v44 = vand.u32 127, %v165_v30 }
  0x38   :  { %180 = vperm.xlu1 %4298, %v151_v45  }
  0x39   :  { %198 = vperm.xlu0 %4299, %v157_v46  }
  0x3c   :  { %183 = vperm.xlu1 %4298, %v152_v47  }
  0x3d   :  { %204 = vperm.xlu0 %4299, %v159_v48  }
  0x40   :  { %186 = vperm.xlu1 %4298, %v153_v49  }
  0x41   :  { %210 = vperm.xlu0 %4299, %v161_v50  }
  0x44   :  { %189 = vperm.xlu1 %4298, %v154_v51  }
  0x45   :  { %216 = vperm.xlu0 %4299, %v163_v52   ;;  %v5751_v52 = vmov 0.0  }
  0x48   :  { %192 = vperm.xlu1 %4298, %v155_v53  }
  0x49   :  { %1803 = vperm.xlu0 %4299, %v704_v54  }
  0x4c   :  { %195 = vperm.xlu1 %4298, %v156_v55  }
  0x50   :  { %201 = vperm.xlu1 %4298, %v158_v56  }
  0x54   :  { %207 = vperm.xlu1 %4298, %v160_v57  }
  0x58   :  { %213 = vperm.xlu1 %4298, %v162_v58  }
  0x5c   :  { %219 = vperm.xlu1 %4298, %v164_v59  }
  0x94   :  { %v76_v60 = vpop.xlane.xlu1 %75  ;;  %v70_v61 = vpop.xlane.xlu0 %69 }
  0x95   :  { %v110_v62 = vmax.f32 %v76_v60, 1e-24  ;;  %v108_v63 = vmax.f32 %v70_v61, 1e-24 }
  0x97   :  { %4314 = vrsqrt.f32 %v110_v62 }
  0x98   :  { %v79_v0 = vpop.xlane.xlu1 %78  ;;  %v73_v4 = vpop.xlane.xlu0 %72  ;;  %4316 = vrsqrt.f32 %v108_v63 }
  0x99   :  { %v111_v5 = vmax.f32 %v79_v0, 1e-24  ;;  %v109_v6 = vmax.f32 %v73_v4, 1e-24 }
  0x9b   :  { %4318 = vrsqrt.f32 %v111_v5 }
  0x9c   :  { %4320 = vrsqrt.f32 %v109_v6  ;;  %v85_v9 = vpop.xlane.xlu1 %84  ;;  %v82_v12 = vpop.xlane.xlu0 %81 }
  0x9d   :  { %v113_v13 = vmax.f32 %v85_v9, 1e-24  ;;  %v112_v14 = vmax.f32 %v82_v12, 1e-24 }
  0x9f   :  { %4322 = vrsqrt.f32 %v113_v13 }
  0xa0   :  { %v91_v15 = vpop.xlane.xlu1 %90  ;;  %4324 = vrsqrt.f32 %v112_v14  ;;  %v88_v16 = vpop.xlane.xlu0 %87 }
  0xa1   :  { %v115_v17 = vmax.f32 %v91_v15, 1e-24  ;;  %v114_v20 = vmax.f32 %v88_v16, 1e-24  ;;  %v4315_v21 = vpop.eup %4314 }
  0xa2   :  { %v4317_v22 = vpop.eup %4316  ;;  %v136_v34 = vmul.f32 %v4315_v21, %v4593_v1 }
  0xa3   :  { %4326 = vrsqrt.f32 %v115_v17  ;;  %v134_v35 = vmul.f32 %v4317_v22, %v4598_v2 }
  0xa4   :  { %v97_v23 = vpop.xlane.xlu1 %96  ;;  %4328 = vrsqrt.f32 %v114_v20  ;;  %v94_v28 = vpop.xlane.xlu0 %93 }
  0xa5   :  { %v4319_v29 = vpop.eup %4318  ;;  %v117_v31 = vmax.f32 %v97_v23, 1e-24  ;;  %v116_v32 = vmax.f32 %v94_v28, 1e-24 }
  0xa6   :  { %v4321_v33 = vpop.eup %4320  ;;  %v137_v38 = vmul.f32 %v4319_v29, %v4603_v3 }
  0xa7   :  { %4330 = vrsqrt.f32 %v117_v31  ;;  %v135_v37 = vmul.f32 %v4321_v33, %v4614_v7 }
  0xa8   :  { %v103_v39 = vpop.xlane.xlu1 %102  ;;  %4332 = vrsqrt.f32 %v116_v32  ;;  %v100_v40 = vpop.xlane.xlu0 %99  ;;  %v3971_v2 = vpack.c.bf16 %v137_v38, %v136_v34 }
  0xa9   :  { %v4323_v41 = vpop.eup %4322  ;;  %v119_v42 = vmax.f32 %v103_v39, 1e-24  ;;  %v3967_v43 = vpack.c.bf16 %v135_v37, %v134_v35  ;;  %v118_v45 = vmax.f32 %v100_v40, 1e-24 }
  0xaa   :  { %v4325_v46 = vpop.eup %4324  ;;  %v139_v1 = vmul.f32 %v4323_v41, %v4623_v10 }
  0xab   :  { %4334 = vrsqrt.f32 %v119_v42  ;;  %3968 = vmatprep.subr.bf16.mxu0 %v3967_v43  ;;  %v138_v7 = vmul.f32 %v4325_v46, %v4628_v11  ;;  %v5753_v46 = vmov 0.0|0.0  }
  0xac   :  { %3970 = vmatpush3.bf16.msra.mxu0 %v3967_v43  ;;  %v169_v3 = vpop.permute.xlu1 %168  ;;  %4336 = vrsqrt.f32 %v118_v45  ;;  %v107_v47 = vpop.xlane.xlu0 %106  ;;  %3991 = vmatprep.subr.bf16.mxu1 %v5753_v46 }
  0xad   :  { %v4327_v48 = vpop.eup %4326  ;;  %vm221_vm3 = vcmp.eq.s32.totalorder %v169_v3, %v4754_v44  ;;  %3972 = vmatprep.subr.bf16.mxu0 %v3971_v2  ;;  %v120_v49 = vmax.f32 %v107_v47, 1e-24  ;;  %v3975_v50 = vpack.c.bf16 %v139_v1, %v138_v7  ;;  %v4303_v1 = vld [vmem:[%s5745_s6 + $0x10] ss:$20 sps:$4 sm:$0xff]  }
  0xae   :  { %v4329_v51 = vpop.eup %4328  ;;  %v2995_v10 = vsel %vm221_vm3, 1.0, %v5751_v52  ;;  %v141_v53 = vmul.f32 %v4327_v48, %v4641_v18 }
  0xaf   :  { %3672 = vmatprep.mubr.msk.f32.mxu0 %vm275_vm2, %v2995_v10  ;;  %v140_v11 = vmul.f32 %v4329_v51, %v4646_v19  ;;  %4338 = vrsqrt.f32 %v120_v49 }
  0xb0   :  { %3974 = vmatpush3.bf16.msra.mxu0 %v3971_v2  ;;  %v175_v54 = vpop.permute.xlu1 %174  ;;  %v4307_v2 = vld [vmem:[%s5745_s6 + $0x38] ss:$20 sps:$4 sm:$0xff]  }
  0xb1   :  { %v4331_v55 = vpop.eup %4330  ;;  %3976 = vmatprep.subr.bf16.mxu0 %v3975_v50  ;;  %v3979_v56 = vpack.c.bf16 %v141_v53, %v140_v11  ;;  %vm223_vm6 = vcmp.eq.s32.totalorder %v175_v54, %v4754_v44 }
  0xb2   :  { %v4333_v57 = vpop.eup %4332  ;;  %v143_v58 = vmul.f32 %v4331_v55, %v4657_v24  ;;  %v2997_v12 = vsel %vm223_vm6, 1.0, %v5751_v52 }
  0xb3   :  { %v142_v59 = vmul.f32 %v4333_v57, %v4662_v25 }
  0xb4   :  { %3978 = vmatpush3.bf16.msra.mxu0 %v3975_v50  ;;  %v178_v60 = vpop.permute.xlu1 %177  ;;  %v172_v25 = vpop.permute.xlu0 %171 }
  0xb5   :  { %v4335_v61 = vpop.eup %4334  ;;  %3980 = vmatprep.subr.bf16.mxu0 %v3979_v56  ;;  %v3983_v18 = vpack.c.bf16 %v143_v58, %v142_v59  ;;  %vm222_vm5 = vcmp.eq.s32.totalorder %v172_v25, %v4754_v44  ;;  %vm224_vm7 = vcmp.eq.s32.totalorder %v178_v60, %v4754_v44  ;;  %v4894_v25 = vld [vmem:[%s5745_s6 + $0xc] ss:$20 sps:$4 sm:$0xff]  }
  0xb6   :  { %v4337_v62 = vpop.eup %4336  ;;  %v145_v63 = vmul.f32 %v4335_v61, %v4667_v26  ;;  %v2996_v26 = vsel %vm222_vm5, 1.0, %v5751_v52 }
  0xb7   :  { %v144_v19 = vmul.f32 %v4337_v62, %v4672_v27  ;;  %v4300_v62 = vld [vmem:[%s5745_s6 + $0x4] ss:$20 sps:$4 sm:$0xff]  }
  0xb8   :  { %3982 = vmatpush3.bf16.msra.mxu0 %v3979_v56  ;;  %v181_v0 = vpop.permute.xlu1 %180  ;;  %v199_v15 = vpop.permute.xlu0 %198 }
  0xb9   :  { %3984 = vmatprep.subr.bf16.mxu0 %v3983_v18  ;;  %v3987_v4 = vpack.c.bf16 %v145_v63, %v144_v19  ;;  %v4339_v5 = vpop.eup %4338  ;;  %vm225_vm8 = vcmp.eq.s32.totalorder %v181_v0, %v4754_v44  ;;  %vm231_vm14 = vcmp.eq.s32.totalorder %v199_v15, %v4754_v44  ;;  %v4918_v15 = vld [vmem:[%s5745_s6 + $0x8] ss:$20 sps:$4 sm:$0xff]  }
  0xba   :  { %v146_v24 = vmul.f32 %v4339_v5, %v4689_v36  ;;  %v2998_v36 = vsel %vm224_vm7, 1.0, %v5751_v52  ;;  %v2999_v14 = vsel %vm225_vm8, 1.0, %v5751_v52  ;;  %v3005_v32 = vsel %vm231_vm14, 1.0, %v5751_v52  ;;  %v4302_v5 = vld [vmem:[%s5745_s6] ss:$20 sps:$4 sm:$0xff]  }
  0xbb   :  { %vm4525_vm8 = vmmov 0  }
  0xbc   :  { %3986 = vmatpush3.bf16.msra.mxu0 %v3983_v18  ;;  %v184_v6 = vpop.permute.xlu1 %183  ;;  %v205_v21 = vpop.permute.xlu0 %204  ;;  %3707 = vmatprep.mubr.msk.f32.mxu1 %vm4525_vm8, %v5751_v52 }
  0xbd   :  { %3988 = vmatprep.subr.bf16.mxu0 %v3987_v4  ;;  %vm226_vm9 = vcmp.eq.s32.totalorder %v184_v6, %v4754_v44  ;;  %vm233_vm1 = vcmp.eq.s32.totalorder %v205_v21, %v4754_v44  ;;  %v4304_v6 = vld [vmem:[%s5745_s6 + $0x2c] ss:$20 sps:$4 sm:$0xff]  }
  0xbe   :  { %v3000_v16 = vsel %vm226_vm9, 1.0, %v5751_v52  ;;  %v3007_v37 = vsel %vm233_vm1, 1.0, %v5751_v52  ;;  %vm1721_vm1 = vcmask 654336  }
  0xc0   :  { %3990 = vmatpush3.bf16.msra.mxu0 %v3987_v4  ;;  %v187_v9 = vpop.permute.xlu1 %186  ;;  %v211_v33 = vpop.permute.xlu0 %210 }
  0xc1   :  { %3670 = vmatprep.subr.msk.mxu0 %vm330_vm4, %v146_v24  ;;  %vm227_vm10 = vcmp.eq.s32.totalorder %v187_v9, %v4754_v44  ;;  %v706_v9 = vld [vmem:[%s5742_s3] sm:$0x3] }
  0xc2   :  { %v3001_v20 = vsel %vm227_vm10, 1.0, %v5751_v52  ;;  %vm832_vm9 = vcmp.gt.f32.partialorder %v706_v9, 0.5  ;;  %v3295_v9 = vld [vmem:[%s5746_s7 + $0xe0] sm:$0xff]  }
  0xc4   :  { %3671 = vmatpush3.msk.msra.mxu0 %vm330_vm4, %v146_v24  ;;  %v190_v27 = vpop.permute.xlu1 %189  ;;  %vm235_vm4 = vcmp.eq.s32.totalorder %v211_v33, %v4754_v44  ;;  %v217_v38 = vpop.permute.xlu0 %216  ;;  %v4306_v24 = vld [vmem:[%s5745_s6 + $0x28] ss:$20 sps:$4 sm:$0xff]  }
  0xc5   :  { %3673 = vmatmul.mubr.msk.f32.vlgmr.msra.gmra.mrb[0].mxu0 %vm275_vm2, %v2996_v26  ;;  %vm228_vm11 = vcmp.eq.s32.totalorder %v190_v27, %v4754_v44  ;;  %v3009_v40 = vsel %vm235_vm4, 1.0, %v5751_v52  ;;  %vm237_vm6 = vcmp.eq.s32.totalorder %v217_v38, %v4754_v44  ;;  %4015 = vmatprep.subr.bf16.mxu0 %v5753_v46  ;;  %v4901_v26 = vshrl.u32 %v165_v30, 7 }
  0xc6   :  { %3675 = vmatprep.mubr.msk.f32.mxu0 %vm275_vm2, %v2997_v12  ;;  %v3002_v22 = vsel %vm228_vm11, 1.0, %v5751_v52  ;;  %v3011_v43 = vsel %vm237_vm6, 1.0, %v5751_v52  ;;  %4017 = vmatpush3.bf16.msra.mxu0 %v4303_v1  ;;  %v4904_v27 = vsel %vm832_vm9, 1, %v4522_v8  ;;  %v5020_v1 = vld [vmem:[%s5746_s7 + $0x18] sm:$0xff]   ;;  %vm2977_vm4 = vcmask 1040384  }
  0xc7   :  { %4018 = vmatprep.subr.bf16.mxu0 %v5753_v46  ;;  %v4907_v12 = vsub.s32 0, %v4901_v26 }
  0xc8   :  { %v193_v13 = vpop.permute.xlu1 %192 }
  0xc9   :  { %3676 = vmatmul.mubr.msk.f32.gmra.mrb[2].mxu0 %vm275_vm2, %v2998_v36  ;;  %vm229_vm12 = vcmp.eq.s32.totalorder %v193_v13, %v4754_v44  ;;  %v837_v36 = vrot.slane %v4904_v27, %v4907_v12  ;;  %v3296_v13 = vld [vmem:[%s5746_s7 + $0xe8] sm:$0xff]  }
  0xca   :  { %3678 = vmatprep.mubr.msk.f32.mxu0 %vm275_vm2, %v2999_v14  ;;  %v3003_v28 = vsel %vm229_vm12, 1.0, %v5751_v52  ;;  %4020 = vmatpush3.bf16.msra.mxu0 %v4307_v2  ;;  %v5026_v2 = vld [vmem:[%s5746_s7 + $0x60] sm:$0xff]  }
  0xcb   :  { %vm4911_vm10 = vcmp.eq.s32.totalorder %v837_v36, 1  ;;  %v3287_v36 = vld [vmem:[%s5746_s7 + $0xa0] sm:$0xff]  }
  0xcc   :  { %v196_v17 = vpop.permute.xlu1 %195 }
  0xcd   :  { %3679 = vmatmul.mubr.msk.f32.gmra.mrb[4].mxu0 %vm275_vm2, %v3000_v16  ;;  %vm230_vm13 = vcmp.eq.s32.totalorder %v196_v17, %v4754_v44  ;;  %v4925_v16 = vld [vmem:[%s5745_s6 + $0x34] ss:$20 sps:$4 sm:$0xff]  }
  0xce   :  { %3681 = vmatprep.mubr.msk.f32.mxu0 %vm275_vm2, %v3001_v20  ;;  %v3004_v29 = vsel %vm230_vm13, 1.0, %v5751_v52  ;;  %v4936_v20 = vld [vmem:[%s5745_s6 + $0x30] ss:$20 sps:$4 sm:$0xff]  }
  0xd0   :  { %v202_v23 = vpop.permute.xlu1 %201 }
  0xd1   :  { %3682 = vmatmul.mubr.msk.f32.gmra.mrb[6].mxu0 %vm275_vm2, %v3002_v22  ;;  %vm232_vm15 = vcmp.eq.s32.totalorder %v202_v23, %v4754_v44  ;;  %v4946_v23 = vld [vmem:[%s5746_s7 + $0x40] sm:$0xff]  }
  0xd2   :  { %3684 = vmatprep.mubr.msk.f32.mxu0 %vm275_vm2, %v3003_v28  ;;  %v3006_v34 = vsel %vm232_vm15, 1.0, %v5751_v52  ;;  %vm1647_vm15 = vcmask 326656  }
  0xd4   :  { %v208_v31 = vpop.permute.xlu1 %207 }
  0xd5   :  { %3685 = vmatmul.mubr.msk.f32.gmra.mrb[8].mxu0 %vm275_vm2, %v3004_v29  ;;  %vm234_vm3 = vcmp.eq.s32.totalorder %v208_v31, %v4754_v44 }
  0xd6   :  { %3687 = vmatprep.mubr.msk.f32.mxu0 %vm275_vm2, %v3005_v32  ;;  %v3008_v39 = vsel %vm234_vm3, 1.0, %v5751_v52  ;;  %vm1810_vm3 = vcmask 162816  }
  0xd8   :  { %v214_v35 = vpop.permute.xlu1 %213 }
  0xd9   :  { %3688 = vmatmul.mubr.msk.f32.gmra.mrb[10].mxu0 %vm275_vm2, %v3006_v34  ;;  %vm236_vm5 = vcmp.eq.s32.totalorder %v214_v35, %v4754_v44 }
  0xda   :  { %3690 = vmatprep.mubr.msk.f32.mxu0 %vm275_vm2, %v3007_v37  ;;  %v3010_v42 = vsel %vm236_vm5, 1.0, %v5751_v52  ;;  %vm2979_vm5 = vcmask 33792  }
  0xdc   :  { %v220_v41 = vpop.permute.xlu1 %219 }
  0xdd   :  { %3691 = vmatmul.mubr.msk.f32.gmra.mrb[12].mxu0 %vm275_vm2, %v3008_v39  ;;  %vm238_vm7 = vcmp.eq.s32.totalorder %v220_v41, %v4754_v44  ;;  %v4975_v39 = vld [vmem:[%s5746_s7] sm:$0xff]   ;;  %v4989_v41 = vld [vmem:[%s5746_s7 + $0x8] sm:$0xff]  }
  0xde   :  { %3693 = vmatprep.mubr.msk.f32.mxu0 %vm275_vm2, %v3009_v40  ;;  %v3012_v45 = vsel %vm238_vm7, 1.0, %v5751_v52  ;;  %v4980_v40 = vld [vmem:[%s5746_s7 + $0x48] sm:$0xff]  }
  0xe1   :  { %3694 = vmatmul.mubr.msk.f32.gmra.mrb[14].mxu0 %vm275_vm2, %v3010_v42  ;;  %v4994_v42 = vld [vmem:[%s5746_s7 + $0x50] sm:$0xff]  }
  0xe2   :  { %3696 = vmatprep.mubr.msk.f32.mxu0 %vm275_vm2, %v3011_v43  ;;  %v5003_v43 = vld [vmem:[%s5746_s7 + $0x10] sm:$0xff]  }
  0xe5   :  { %3697 = vmatmul.mubr.msk.f32.gmra.mrb[16].mxu0 %vm275_vm2, %v3012_v45  ;;  %vm4844_vm2 = vmpackc.low %vm67_vm0, %vm67_vm0  ;;  %v5014_v45 = vld [vmem:[%s5746_s7 + $0x58] sm:$0xff]  }
  0xe6   :  { %3730 = vmatprep.mubr.msk.f32.mxu0 %vm4525_vm8, %v5751_v52 }
 0x198   :  { %v3674_v7 = vpop.f32.mrb[0].mxu0 }
 0x199   :  { %v400_v3 = vpop.f32.mrb[1].mxu0 }
 0x19c   :  { %v3677_v47 = vpop.f32.mrb[2].mxu0 }
 0x19d   :  { %v410_v48 = vpop.f32.mrb[3].mxu0 }
 0x1a0   :  { %v4832_v49 = vpop.f32.mrb[4].mxu0 }
 0x1a1   :  { %v420_v50 = vpop.f32.mrb[5].mxu0 }
 0x1a4   :  { %v4834_v51 = vpop.f32.mrb[6].mxu0 }
 0x1a5   :  { %v4836_v10 = vpop.f32.mrb[7].mxu0 }
 0x1a8   :  { %v4838_v53 = vpop.f32.mrb[8].mxu0 }
 0x1a9   :  { %v4840_v11 = vpop.f32.mrb[9].mxu0 }
 0x1ac   :  { %v3689_v54 = vpop.f32.mrb[10].mxu0 }
 0x1ad   :  { %v450_v55 = vpop.f32.mrb[11].mxu0 }
 0x1ae   :  { %v3992_v57 = vpack.c.bf16 %v3689_v54, %v450_v55  ;;  %v5056_v54 = vld [vmem:[%s5746_s7 + $0x70] sm:$0xff]  }
 0x1af   :  { %5769 = vst [vmem:[#allocation6_spill] sm:$0xff] %v5056_v54  ;;  %v5062_v55 = vld [vmem:[%s5746_s7 + $0x30] sm:$0xff]  }
 0x1b0   :  { %v3692_v58 = vpop.f32.mrb[12].mxu0  ;;  %3994 = vmatpush3.bf16.xpose.msk.msra.mxu1 %vm4844_vm2, %v3992_v57  ;;  %5770 = vst [vmem:[#allocation7_spill] sm:$0xff] %v5062_v55  ;;  %v3292_v57 = vld [vmem:[%s5746_s7 + $0xc8] sm:$0xff]  }
 0x1b1   :  { %v460_v59 = vpop.f32.mrb[13].mxu0  ;;  %3995 = vmatprep.subr.bf16.mxu1 %v5753_v46 }
 0x1b2   :  { %v3996_v60 = vpack.c.bf16 %v3692_v58, %v460_v59  ;;  %v3284_v58 = vld [vmem:[%s5746_s7 + $0x88] sm:$0xff]   ;;  %v5074_v59 = vld [vmem:[%s5746_s7 + $0x78] sm:$0xff]  }
 0x1b3   :  { %5771 = vst [vmem:[#allocation8_spill] sm:$0xff] %v5074_v59 }
 0x1b4   :  { %v4851_v61 = vpop.f32.mrb[14].mxu0 }
 0x1b5   :  { %v4853_v18 = vpop.f32.mrb[15].mxu0 }
 0x1b8   :  { %v4860_v19 = vpop.f32.mrb[16].mxu0  ;;  %3998 = vmatpush3.bf16.xpose.msk.msra.mxu1 %vm4844_vm2, %v3996_v60  ;;  %v5080_v60 = vld [vmem:[%s5746_s7 + $0x38] sm:$0xff]  }
 0x1b9   :  { %v4864_v0 = vpop.f32.mrb[17].mxu0  ;;  %4000 = vmatprep.subr.bf16.mxu1 %v4300_v62  ;;  %5772 = vst [vmem:[#allocation9_spill] sm:$0xff] %v5080_v60  ;;  %v3293_v62 = vld [vmem:[%s5746_s7 + $0xd0] sm:$0xff]  }
 0x1bf   :  { %3708 = vmatmul.mubr.msk.f32.vlgmr.msra.gmra.mrb[0].mxu1 %vm67_vm0, %v400_v3  ;;  %v5038_v3 = vld [vmem:[%s5746_s7 + $0x68] sm:$0xff]  }
 0x1c0   :  { %3710 = vmatprep.mubr.msk.f32.mxu1 %vm4525_vm8, %v5751_v52  ;;  %4002 = vmatpush1.bf16.msra.mxu1 %v4302_v5  ;;  %v3285_v5 = vld [vmem:[%s5746_s7 + $0x90] sm:$0xff]  }
 0x1c1   :  { %4004 = vmatprep.subr.bf16.mxu1 %v4304_v6  ;;  %v3294_v6 = vld [vmem:[%s5746_s7 + $0xd8] sm:$0xff]  }
 0x1c3   :  { %3711 = vmatmul.mubr.msk.f32.gmra.mrb[2].mxu1 %vm67_vm0, %v3674_v7  ;;  %v5032_v7 = vld [vmem:[%s5746_s7 + $0x20] sm:$0xff]  }
 0x1c4   :  { %3713 = vmatprep.mubr.msk.f32.mxu1 %vm4525_vm8, %v5751_v52  ;;  %4006 = vmatpush1.bf16.msra.mxu1 %v4306_v24  ;;  %v3286_v24 = vld [vmem:[%s5746_s7 + $0x98] sm:$0xff]  }
 0x1c5   :  { %4008 = vmatprep.subr.bf16.mxu1 %v4894_v25 }
 0x1c7   :  { %3714 = vmatmul.mubr.msk.f32.gmra.mrb[4].mxu1 %vm67_vm0, %v410_v48  ;;  %v3291_v48 = vld [vmem:[%s5746_s7 + $0xc0] sm:$0xff]  }
 0x1c8   :  { %3716 = vmatprep.mubr.msk.f32.mxu1 %vm4525_vm8, %v5751_v52  ;;  %4054 = vmatprep.subr.bf16.mxu0 %v3291_v48 }
 0x1cb   :  { %3717 = vmatmul.mubr.msk.f32.gmra.mrb[6].mxu1 %vm67_vm0, %v3677_v47  ;;  %v5044_v47 = vld [vmem:[%s5746_s7 + $0x28] sm:$0xff]  }
 0x1cc   :  { %3719 = vmatprep.mubr.msk.f32.mxu1 %vm4525_vm8, %v5751_v52 }
 0x1cf   :  { %3720 = vmatmul.mubr.msk.f32.gmra.mrb[8].mxu1 %vm67_vm0, %v420_v50  ;;  %v3283_v50 = vld [vmem:[%s5746_s7 + $0x80] sm:$0xff]  }
 0x1d0   :  { %923 = vmatprep.mubr.f32.mxu1 %v5751_v52 }
 0x292   :  { %v808_v14 = vpop.f32.mrb[0].mxu1 }
 0x293   :  { %v839_v8 = vsel %vm4911_vm10, %v808_v14, 10000.0  ;;  %v3709_v30 = vpop.f32.mrb[1].mxu1  ;;  %v3288_v14 = vld [vmem:[%s5746_s7 + $0xa8] sm:$0xff]  }
 0x294   :  { %3041 = vmatmul.mubr.msk.f32.vlgmr.msra.gmra.mrb[10].mxu1 %vm67_vm0, %v839_v8  ;;  %3731 = vmatmul.mubr.msk.f32.vlgmr.msra.gmra.mrb[18].mxu0 %vm67_vm0, %v839_v8  ;;  %v3289_v30 = vld [vmem:[%s5746_s7 + $0xb0] sm:$0xff]  }
 0x295   :  { %929 = vmatprep.mubr.f32.mxu1 %v5751_v52  ;;  %3733 = vmatprep.mubr.msk.f32.mxu0 %vm4525_vm8, %v5751_v52 }
 0x296   :  { %v813_v17 = vpop.f32.mrb[2].mxu1  ;;  %4010 = vmatpush1.bf16.msra.mxu1 %v4918_v15  ;;  %4056 = vmatpush3.bf16.msra.mxu0 %v3283_v50 }
 0x297   :  { %v840_v21 = vsel %vm4911_vm10, %v813_v17, 10000.0  ;;  %v3712_v22 = vpop.f32.mrb[3].mxu1  ;;  %4012 = vmatprep.subr.bf16.mxu1 %v4925_v16  ;;  %4058 = vmatprep.subr.bf16.mxu0 %v3292_v57  ;;  %v3298_v17 = vld [vmem:[%s5746_s7 + $0xf8] sm:$0xff]  }
 0x298   :  { %3042 = vmatmul.mubr.msk.f32.gmra.mrb[12].mxu1 %vm67_vm0, %v840_v21  ;;  %3734 = vmatmul.mubr.msk.f32.gmra.mrb[20].mxu0 %vm67_vm0, %v840_v21  ;;  %v5124_v22 = vld [vmem:[%s5744_s5] sm:$0xff] }
 0x299   :  { %935 = vmatprep.mubr.f32.mxu1 %v5751_v52  ;;  %3736 = vmatprep.mubr.msk.f32.mxu0 %vm4525_vm8, %v5751_v52 }
 0x29a   :  { %v818_v28 = vpop.f32.mrb[4].mxu1  ;;  %4014 = vmatpush1.bf16.msra.mxu1 %v4936_v20  ;;  %4060 = vmatpush3.bf16.msra.mxu0 %v3284_v58 }
 0x29b   :  { %v841_v29 = vsel %vm4911_vm10, %v818_v28, 10000.0  ;;  %v3715_v31 = vpop.f32.mrb[5].mxu1  ;;  %4022 = vmatprep.subr.bf16.mxu1 %v4946_v23  ;;  %4062 = vmatprep.subr.bf16.mxu0 %v3293_v62  ;;  %v1147_v28 = vsub.s32 2, %v4901_v26 }
 0x29c   :  { %3043 = vmatmul.mubr.msk.f32.gmra.mrb[14].mxu1 %vm67_vm0, %v841_v29  ;;  %3737 = vmatmul.mubr.msk.f32.gmra.mrb[22].mxu0 %vm67_vm0, %v841_v29  ;;  %v1144_v31 = vrot.slane %v5124_v22, %v4907_v12 }
 0x29d   :  { %941 = vmatprep.mubr.f32.mxu1 %v5751_v52  ;;  %3739 = vmatprep.mubr.msk.f32.mxu0 %vm4525_vm8, %v5751_v52 }
 0x29e   :  { %v823_v32 = vpop.f32.mrb[6].mxu1  ;;  %4064 = vmatpush3.bf16.msra.mxu0 %v3285_v5 }
 0x29f   :  { %v842_v33 = vsel %vm4911_vm10, %v823_v32, 10000.0  ;;  %v3718_v34 = vpop.f32.mrb[7].mxu1  ;;  %4066 = vmatprep.subr.bf16.mxu0 %v3294_v6  ;;  %v1148_v32 = vrot.slane %v5124_v22, %v1147_v28 }
 0x2a0   :  { %3044 = vmatmul.mubr.msk.f32.gmra.mrb[16].mxu1 %vm67_vm0, %v842_v33  ;;  %3740 = vmatmul.mubr.msk.f32.gmra.mrb[24].mxu0 %vm67_vm0, %v842_v33  ;;  %v5135_v34 = vrot.slane %v1144_v31, %v4907_v12 }
 0x2a1   :  { %947 = vmatprep.mubr.f32.mxu1 %v5751_v52  ;;  %3742 = vmatprep.mubr.msk.f32.mxu0 %vm4525_vm8, %v5751_v52 }
 0x2a2   :  { %v828_v35 = vpop.f32.mrb[8].mxu1  ;;  %4068 = vmatpush3.bf16.msra.mxu0 %v3286_v24  ;;  %5773 = vst [vmem:[#allocation10_spill] sm:$0xff] %v5135_v34 }
 0x2a3   :  { %v843_v37 = vsel %vm4911_vm10, %v828_v35, 10000.0  ;;  %v3721_v38 = vpop.f32.mrb[9].mxu1  ;;  %4070 = vmatprep.subr.bf16.mxu0 %v3295_v9 }
 0x2a4   :  { %3045 = vmatmul.mubr.msk.f32.gmra.mrb[18].mxu1 %vm67_vm0, %v843_v37  ;;  %3743 = vmatmul.mubr.msk.f32.gmra.mrb[26].mxu0 %vm67_vm0, %v843_v37 }
 0x2a5   :  { %1018 = vmatprep.mubr.f32.mxu1 %v5751_v52 }
 0x2a6   :  { %4072 = vmatpush3.bf16.msra.mxu0 %v3287_v36 }
 0x2a7   :  { %4074 = vmatprep.subr.bf16.mxu0 %v3296_v13 }
 0x2a8   :  { %3046 = vmatmul.mubr.msk.f32.vlgmr.msra.gmra.mrb[20].mxu1 %vm67_vm0, %v839_v8  ;;  %v3297_v8 = vld [vmem:[%s5746_s7 + $0xf0] sm:$0xff]  }
 0x2a9   :  { %1024 = vmatprep.mubr.f32.mxu1 %v5751_v52  ;;  %4024 = vmatpush3.bf16.msra.mxu1 %v4975_v39 }
 0x2aa   :  { %4026 = vmatprep.subr.bf16.mxu1 %v4980_v40  ;;  %4076 = vmatpush3.bf16.msra.mxu0 %v3288_v14 }
 0x2ab   :  { %4078 = vmatprep.subr.bf16.mxu0 %v3297_v8 }
 0x2ac   :  { %3047 = vmatmul.mubr.msk.f32.gmra.mrb[22].mxu1 %vm67_vm0, %v840_v21  ;;  %v3290_v21 = vld [vmem:[%s5746_s7 + $0xb8] sm:$0xff]  }
 0x2ad   :  { %1030 = vmatprep.mubr.f32.mxu1 %v5751_v52  ;;  %4028 = vmatpush3.bf16.msra.mxu1 %v4989_v41 }
 0x2ae   :  { %4030 = vmatprep.subr.bf16.mxu1 %v4994_v42  ;;  %4080 = vmatpush3.bf16.msra.mxu0 %v3289_v30 }
 0x2af   :  { %4082 = vmatprep.subr.bf16.mxu0 %v3298_v17 }
 0x2b0   :  { %3048 = vmatmul.mubr.msk.f32.gmra.mrb[24].mxu1 %vm67_vm0, %v841_v29  ;;  %v5128_v29 = vsub.s32 1, %v4901_v26 }
 0x2b1   :  { %1036 = vmatprep.mubr.f32.mxu1 %v5751_v52  ;;  %4032 = vmatpush3.bf16.msra.mxu1 %v5003_v43 }
 0x2b2   :  { %4034 = vmatprep.subr.bf16.mxu1 %v5014_v45  ;;  %4084 = vmatpush3.bf16.msra.mxu0 %v3290_v21  ;;  %v1239_v35 = vrot.slane %v5124_v22, %v5128_v29 }
 0x2b3   :  { %4109 = vmatprep.subr.bf16.mxu0 %v5753_v46 }
 0x2b4   :  { %3049 = vmatmul.mubr.msk.f32.gmra.mrb[26].mxu1 %vm67_vm0, %v842_v33  ;;  %v1242_v33 = vsub.s32 3, %v4901_v26  ;;  %v5147_v58 = vrot.slane %v1239_v35, %v5128_v29 }
 0x2b5   :  { %1042 = vmatprep.mubr.f32.mxu1 %v5751_v52  ;;  %4036 = vmatpush3.bf16.msra.mxu1 %v5020_v1 }
 0x2b6   :  { %4038 = vmatprep.subr.bf16.mxu1 %v5026_v2  ;;  %v1243_v38 = vrot.slane %v5124_v22, %v1242_v33  ;;  %5774 = vst [vmem:[#allocation11_spill] sm:$0xff] %v5147_v58 }
 0x2b8   :  { %3050 = vmatmul.mubr.msk.f32.gmra.mrb[28].mxu1 %vm67_vm0, %v843_v37  ;;  %v5140_v37 = vrot.slane %v1148_v32, %v4907_v12  ;;  %v5151_v24 = vrot.slane %v1243_v38, %v5128_v29 }
 0x2b9   :  { %4040 = vmatpush3.bf16.msra.mxu1 %v5032_v7 }
 0x2ba   :  { %4042 = vmatprep.subr.bf16.mxu1 %v5038_v3  ;;  %5775 = vst [vmem:[#allocation12_spill] sm:$0xff] %v5151_v24 }
 0x2bd   :  { %4044 = vmatpush3.bf16.msra.mxu1 %v5044_v47 }
 0x2be   :  { %4046 = vmatprep.subr.bf16.mxu1 %v5056_v54 }
 0x2c1   :  { %4048 = vmatpush3.bf16.msra.mxu1 %v5062_v55 }
 0x2c2   :  { %4050 = vmatprep.subr.bf16.mxu1 %v5074_v59 }
 0x2c5   :  { %4052 = vmatpush3.bf16.msra.mxu1 %v5080_v60 }
 0x2c6   :  { %4085 = vmatprep.subr.bf16.mxu1 %v5753_v46  ;;  %v1246_v46 = vsub.s32 5, %v4901_v26 }
 0x2c8   :  { %v1247_v54 = vrot.slane %v5124_v22, %v1246_v46 }
 0x367   :  { %v925_v48 = vpop.f32.mrb[10].mxu1  ;;  %v5143_v50 = vpop.f32.mrb[18].mxu0 }
 0x368   :  { %v1186_v57 = vsub.f32 %v925_v48, %v5135_v34  ;;  %v927_v62 = vpop.f32.mrb[11].mxu1  ;;  %v3732_v5 = vpop.f32.mrb[19].mxu0 }
 0x369   :  { %v1187_v6 = vsub.f32 %v927_v62, %v5140_v37 }
 0x36a   :  { %v1211_v9 = vmul.f32 %v1186_v57, %v1186_v57 }
 0x36b   :  { %v1212_v36 = vmul.f32 %v1187_v6, %v1187_v6  ;;  %v931_v13 = vpop.f32.mrb[12].mxu1  ;;  %v5153_v14 = vpop.f32.mrb[20].mxu0 }
 0x36c   :  { %v1281_v8 = vmul.f32 %v5147_v58, %v1211_v9  ;;  %v1191_v30 = vsub.f32 %v931_v13, %v5135_v34  ;;  %v933_v17 = vpop.f32.mrb[13].mxu1  ;;  %v3735_v21 = vpop.f32.mrb[21].mxu0  ;;  %v1151_v13 = vsub.s32 4, %v4901_v26 }
 0x36d   :  { %v1282_v28 = vmul.f32 %v5151_v24, %v1212_v36  ;;  %v1192_v31 = vsub.f32 %v933_v17, %v5140_v37 }
 0x36e   :  { %v1216_v32 = vmul.f32 %v1191_v30, %v1191_v30  ;;  %v1306_v33 = vmul.f32 1.442695, %v1281_v8  ;;  %v1155_v30 = vsub.s32 6, %v4901_v26  ;;  %v5170_v8 = vld [vmem:[%s5744_s5 + $0x8] sm:$0x3]  ;;  %v1152_v52 = vrot.slane %v5124_v22, %v1151_v13 }
 0x36f   :  { %v1308_v35 = vmul.f32 1.442695, %v1282_v28  ;;  %v1217_v38 = vmul.f32 %v1192_v31, %v1192_v31  ;;  %v937_v48 = vpop.f32.mrb[14].mxu1  ;;  %v5159_v57 = vpop.f32.mrb[22].mxu0 }
 0x370   :  { %v1286_v62 = vmul.f32 %v5147_v58, %v1216_v32  ;;  %v1196_v5 = vsub.f32 %v937_v48, %v5135_v34  ;;  %v939_v6 = vpop.f32.mrb[15].mxu1  ;;  %v3738_v9 = vpop.f32.mrb[23].mxu0  ;;  %v5189_v55 = vrot.slane %v1152_v52, %v4907_v12 }
 0x371   :  { %v1287_v21 = vmul.f32 %v5151_v24, %v1217_v38  ;;  %v1197_v36 = vsub.f32 %v939_v6, %v5140_v37  ;;  %4340 = vpow2.f32 %v1308_v35 }
 0x372   :  { %v1221_v17 = vmul.f32 %v1196_v5, %v1196_v5  ;;  %4342 = vpow2.f32 %v1306_v33  ;;  %v1316_v28 = vmul.f32 1.442695, %v1286_v62  ;;  %v1156_v62 = vrot.slane %v5124_v22, %v1155_v30 }
 0x373   :  { %v1318_v31 = vmul.f32 1.442695, %v1287_v21  ;;  %v1222_v32 = vmul.f32 %v1197_v36, %v1197_v36  ;;  %v943_v48 = vpop.f32.mrb[16].mxu1  ;;  %v5172_v9 = vpop.f32.mrb[24].mxu0  ;;  %v1250_v5 = vsub.s32 7, %v4901_v26  ;;  %v1160_v21 = vrot.slane %v5170_v8, %v4907_v12 }
 0x374   :  { %v1291_v38 = vmul.f32 %v5147_v58, %v1221_v17  ;;  %v1201_v6 = vsub.f32 %v943_v48, %v5135_v34  ;;  %v945_v4 = vpop.f32.mrb[17].mxu1  ;;  %v3741_v63 = vpop.f32.mrb[25].mxu0 }
 0x375   :  { %v1292_v35 = vmul.f32 %v5151_v24, %v1222_v32  ;;  %v1202_v33 = vsub.f32 %v945_v4, %v5140_v37  ;;  %4344 = vpow2.f32 %v1318_v31 }
 0x376   :  { %v1226_v36 = vmul.f32 %v1201_v6, %v1201_v6  ;;  %4346 = vpow2.f32 %v1316_v28  ;;  %v1326_v17 = vmul.f32 1.442695, %v1291_v38  ;;  %v5195_v38 = vrot.slane %v1156_v62, %v4907_v12 }
 0x377   :  { %v1328_v63 = vmul.f32 1.442695, %v1292_v35  ;;  %v1227_v48 = vmul.f32 %v1202_v33, %v1202_v33  ;;  %v949_v13 = vpop.f32.mrb[18].mxu1  ;;  %v5184_v60 = vpop.f32.mrb[26].mxu0  ;;  %v1251_v6 = vrot.slane %v5124_v22, %v1250_v5  ;;  %v5204_v62 = vrot.slane %v1247_v54, %v5128_v29  ;;  %v3299_v22 = vld [vmem:[%s5746_s7 + $0x100] sm:$0xff]  }
 0x378   :  { %v1296_v32 = vmul.f32 %v5147_v58, %v1226_v36  ;;  %v1206_v4 = vsub.f32 %v949_v13, %v5135_v34  ;;  %v951_v59 = vpop.f32.mrb[19].mxu1  ;;  %v3744_v30 = vpop.f32.mrb[27].mxu0  ;;  %v5199_v34 = vrot.slane %v1160_v21, %v4907_v12 }
 0x379   :  { %v1297_v31 = vmul.f32 %v5151_v24, %v1227_v48  ;;  %v1207_v28 = vsub.f32 %v951_v59, %v5140_v37  ;;  %4348 = vpow2.f32 %v1328_v63  ;;  %v5212_v21 = vrot.slane %v1251_v6, %v5128_v29 }
 0x37a   :  { %v1231_v35 = vmul.f32 %v1206_v4, %v1206_v4  ;;  %4350 = vpow2.f32 %v1326_v17  ;;  %v1336_v33 = vmul.f32 1.442695, %v1296_v32 }
 0x37b   :  { %v1338_v36 = vmul.f32 1.442695, %v1297_v31  ;;  %v1232_v13 = vmul.f32 %v1207_v28, %v1207_v28  ;;  %v1020_v30 = vpop.f32.mrb[20].mxu1  ;;  %v4341_v52 = vpop.eup %4340 }
 0x37c   :  { %v1301_v46 = vmul.f32 %v5147_v58, %v1231_v35  ;;  %v1188_v59 = vsub.f32 %v1020_v30, %v5189_v55  ;;  %v1022_v48 = vpop.f32.mrb[21].mxu1  ;;  %v4343_v5 = vpop.eup %4342  ;;  %1420 = vmatprep.mubr.f32.mxu1 %v4341_v52  ;;  %v1190_v30 = vsub.f32 %v5143_v50, %v5199_v34 }
 0x37d   :  { %v1302_v17 = vmul.f32 %v5151_v24, %v1232_v13  ;;  %v1189_v63 = vsub.f32 %v1022_v48, %v5195_v38  ;;  %4352 = vpow2.f32 %v1338_v36  ;;  %1421 = vmatmul.mubr.f32.vlgmr.msra.gmra.mrb[30].mxu1 %v4343_v5  ;;  %v1255_v13 = vrot.slane %v5170_v8, %v5128_v29 }
 0x37e   :  { %v1213_v32 = vmul.f32 %v1188_v59, %v1188_v59  ;;  %4354 = vpow2.f32 %v1336_v33  ;;  %v1346_v54 = vmul.f32 1.442695, %v1301_v46  ;;  %4087 = vmatpush3.bf16.msra.mxu1 %v3299_v22  ;;  %v5776_v59 = vmov 0.0|0.0   ;;  %v3300_v33 = vld [vmem:[%s5746_s7 + $0x108] sm:$0xff]  }
 0x37f   :  { %v1348_v4 = vmul.f32 1.442695, %v1302_v17  ;;  %v1214_v31 = vmul.f32 %v1189_v63, %v1189_v63  ;;  %v1026_v28 = vpop.f32.mrb[22].mxu1  ;;  %v4345_v35 = vpop.eup %4344  ;;  %4088 = vmatprep.subr.bf16.mxu1 %v5776_v59  ;;  %v5227_v24 = vrot.slane %v1255_v13, %v5128_v29  ;;  %v1195_v13 = vsub.f32 %v5153_v14, %v5199_v34 }
 0x380   :  { %v1283_v6 = vmul.f32 %v5204_v62, %v1213_v32  ;;  %v1193_v52 = vsub.f32 %v1026_v28, %v5189_v55  ;;  %v1028_v36 = vpop.f32.mrb[23].mxu1  ;;  %v4347_v46 = vpop.eup %4346  ;;  %1425 = vmatprep.mubr.f32.mxu1 %v4345_v35  ;;  %v1215_v28 = vmul.f32 %v1190_v30, %v1190_v30 }
 0x381   :  { %v1284_v48 = vmul.f32 %v5212_v21, %v1214_v31  ;;  %v1194_v22 = vsub.f32 %v1028_v36, %v5195_v38  ;;  %4356 = vpow2.f32 %v1348_v4  ;;  %1426 = vmatmul.mubr.f32.gmra.mrb[32].mxu1 %v4347_v46 }
 0x382   :  { %v1310_v50 = vmul.f32 1.442695, %v1283_v6  ;;  %v1218_v8 = vmul.f32 %v1193_v52, %v1193_v52  ;;  %4358 = vpow2.f32 %v1346_v54  ;;  %4090 = vmatpush3.bf16.msra.mxu1 %v3300_v33  ;;  %v3301_v54 = vld [vmem:[%s5746_s7 + $0x110] sm:$0xff]  }
 0x383   :  { %v1312_v5 = vmul.f32 1.442695, %v1284_v48  ;;  %v1219_v17 = vmul.f32 %v1194_v22, %v1194_v22  ;;  %v1032_v63 = vpop.f32.mrb[24].mxu1  ;;  %v4349_v32 = vpop.eup %4348  ;;  %4091 = vmatprep.subr.bf16.mxu1 %v5776_v59 }
 0x384   :  { %v1288_v58 = vmul.f32 %v5204_v62, %v1218_v8  ;;  %v1198_v31 = vsub.f32 %v1032_v63, %v5189_v55  ;;  %v1034_v36 = vpop.f32.mrb[25].mxu1  ;;  %v4351_v4 = vpop.eup %4350  ;;  %1430 = vmatprep.mubr.f32.mxu1 %v4349_v32  ;;  %v1285_v8 = vmul.f32 %v5227_v24, %v1215_v28 }
 0x385   :  { %4360 = vpow2.f32 %v1312_v5  ;;  %v1289_v35 = vmul.f32 %v5212_v21, %v1219_v17  ;;  %v1199_v30 = vsub.f32 %v1034_v36, %v5195_v38  ;;  %1431 = vmatmul.mubr.f32.gmra.mrb[34].mxu1 %v4351_v4 }
 0x386   :  { %4362 = vpow2.f32 %v1310_v50  ;;  %v1320_v6 = vmul.f32 1.442695, %v1288_v58  ;;  %v1223_v52 = vmul.f32 %v1198_v31, %v1198_v31  ;;  %4093 = vmatpush3.bf16.msra.mxu1 %v3301_v54  ;;  %v3302_v58 = vld [vmem:[%s5746_s7 + $0x118] sm:$0xff]   ;;  %v1220_v31 = vmul.f32 %v1195_v13, %v1195_v13  ;;  %v5256_v13 = vld [vmem:[%s5746_s7 + $0x120] sm:$0xff]  }
 0x387   :  { %v1322_v33 = vmul.f32 1.442695, %v1289_v35  ;;  %v1224_v46 = vmul.f32 %v1199_v30, %v1199_v30  ;;  %v1038_v48 = vpop.f32.mrb[26].mxu1  ;;  %v4353_v22 = vpop.eup %4352  ;;  %4094 = vmatprep.subr.bf16.mxu1 %v5776_v59  ;;  %v1200_v54 = vsub.f32 %v5159_v57, %v5199_v34 }
 0x388   :  { %v1293_v5 = vmul.f32 %v5204_v62, %v1223_v52  ;;  %v1203_v17 = vsub.f32 %v1038_v48, %v5189_v55  ;;  %v1040_v63 = vpop.f32.mrb[27].mxu1  ;;  %v4355_v14 = vpop.eup %4354  ;;  %1435 = vmatprep.mubr.f32.mxu1 %v4353_v22  ;;  %v1314_v48 = vmul.f32 1.442695, %v1285_v8  ;;  %v1290_v8 = vmul.f32 %v5227_v24, %v1220_v31 }
 0x389   :  { %4364 = vpow2.f32 %v1322_v33  ;;  %v1294_v50 = vmul.f32 %v5212_v21, %v1224_v46  ;;  %v1204_v32 = vsub.f32 %v1040_v63, %v5195_v38  ;;  %1436 = vmatmul.mubr.f32.gmra.mrb[36].mxu1 %v4355_v14  ;;  %v1225_v14 = vmul.f32 %v1200_v54, %v1200_v54 }
 0x38a   :  { %4366 = vpow2.f32 %v1320_v6  ;;  %v1330_v28 = vmul.f32 1.442695, %v1293_v5  ;;  %v1228_v36 = vmul.f32 %v1203_v17, %v1203_v17  ;;  %4096 = vmatpush3.bf16.msra.mxu1 %v3302_v58  ;;  %v1324_v54 = vmul.f32 1.442695, %v1290_v8 }
 0x38b   :  { %v1332_v4 = vmul.f32 1.442695, %v1294_v50  ;;  %v1229_v35 = vmul.f32 %v1204_v32, %v1204_v32  ;;  %v1044_v30 = vpop.f32.mrb[28].mxu1  ;;  %v4357_v52 = vpop.eup %4356  ;;  %4097 = vmatprep.subr.bf16.mxu1 %v5776_v59  ;;  %v1205_v50 = vsub.f32 %v5172_v9, %v5199_v34 }
 0x38c   :  { %v1298_v33 = vmul.f32 %v5204_v62, %v1228_v36  ;;  %v1208_v46 = vsub.f32 %v1044_v30, %v5189_v55  ;;  %v1046_v63 = vpop.f32.mrb[29].mxu1  ;;  %v4359_v6 = vpop.eup %4358  ;;  %1440 = vmatprep.mubr.f32.mxu1 %v4357_v52 }
 0x38d   :  { %4368 = vpow2.f32 %v1332_v4  ;;  %v1299_v57 = vmul.f32 %v5212_v21, %v1229_v35  ;;  %v1209_v22 = vsub.f32 %v1046_v63, %v5195_v38  ;;  %1441 = vmatmul.mubr.f32.gmra.mrb[38].mxu1 %v4359_v6  ;;  %v5777_v4 = vmov 0.0  }
 0x38e   :  { %4370 = vpow2.f32 %v1330_v28  ;;  %v1340_v5 = vmul.f32 1.442695, %v1298_v33  ;;  %v1233_v17 = vmul.f32 %v1208_v46, %v1208_v46  ;;  %4099 = vmatpush3.bf16.msra.mxu1 %v5256_v13  ;;  %3777 = vmatprep.mubr.msk.f32.mxu1 %vm4525_vm8, %v5777_v4  ;;  %v5271_v28 = vld [vmem:[%s5746_s7 + $0x128] sm:$0xff]   ;;  %v1230_v33 = vmul.f32 %v1205_v50, %v1205_v50 }
 0x38f   :  { %v4361_v58 = vpop.eup %4360  ;;  %v1342_v32 = vmul.f32 1.442695, %v1299_v57  ;;  %v1234_v36 = vmul.f32 %v1209_v22, %v1209_v22  ;;  %4372 = vpow2.f32 %v1314_v48  ;;  %4100 = vmatprep.subr.bf16.mxu1 %v5776_v59  ;;  %v1295_v48 = vmul.f32 %v5227_v24, %v1225_v14  ;;  %v5282_v57 = vld [vmem:[%s5746_s7 + $0x130] sm:$0xff]  }
 0x390   :  { %v4363_v35 = vpop.eup %4362  ;;  %v1303_v31 = vmul.f32 %v5204_v62, %v1233_v17  ;;  %1510 = vmatprep.mubr.f32.mxu0 %v4361_v58  ;;  %v1210_v46 = vsub.f32 %v5184_v60, %v5199_v34  ;;  %v1300_v60 = vmul.f32 %v5227_v24, %v1230_v33  ;;  %v5290_v58 = vld [vmem:[%s5746_s7 + $0x138] sm:$0xff]  }
 0x391   :  { %4374 = vpow2.f32 %v1342_v32  ;;  %v1304_v9 = vmul.f32 %v5212_v21, %v1234_v36  ;;  %1511 = vmatmul.mubr.f32.vlgmr.msra.gmra.mrb[28].mxu0 %v4363_v35  ;;  %v1334_v8 = vmul.f32 1.442695, %v1295_v48 }
 0x392   :  { %4376 = vpow2.f32 %v1340_v5  ;;  %v1350_v30 = vmul.f32 1.442695, %v1303_v31  ;;  %4102 = vmatpush3.bf16.msra.mxu1 %v5271_v28  ;;  %v1235_v5 = vmul.f32 %v1210_v46, %v1210_v46  ;;  %v1344_v32 = vmul.f32 1.442695, %v1300_v60 }
 0x393   :  { %v4365_v52 = vpop.eup %4364  ;;  %v1352_v63 = vmul.f32 1.442695, %v1304_v9  ;;  %4103 = vmatprep.subr.bf16.mxu1 %v5776_v59  ;;  %v5779_v46 = vpack.c.bf16 %v4860_v19, %v4864_v0 }
 0x394   :  { %v4367_v6 = vpop.eup %4366  ;;  %1515 = vmatprep.mubr.f32.mxu0 %v4365_v52  ;;  %v1305_v36 = vmul.f32 %v5227_v24, %v1235_v5  ;;  %v5778_v52 = vpack.c.bf16 %v4851_v61, %v4853_v18 }
 0x395   :  { %4378 = vpow2.f32 %v1352_v63  ;;  %1516 = vmatmul.mubr.f32.gmra.mrb[30].mxu0 %v4367_v6 }
 0x396   :  { %4380 = vpow2.f32 %v1350_v30  ;;  %4105 = vmatpush3.bf16.msra.mxu1 %v5282_v57  ;;  %v1354_v9 = vmul.f32 1.442695, %v1305_v36 }
 0x397   :  { %v4369_v22 = vpop.eup %4368  ;;  %4382 = vpow2.f32 %v1324_v54  ;;  %4106 = vmatprep.subr.bf16.mxu1 %v5776_v59 }
 0x398   :  { %v4371_v17 = vpop.eup %4370  ;;  %1520 = vmatprep.mubr.f32.mxu0 %v4369_v22  ;;  %4384 = vpow2.f32 %v1334_v8 }
 0x399   :  { %1521 = vmatmul.mubr.f32.gmra.mrb[32].mxu0 %v4371_v17  ;;  %v4373_v14 = vpop.eup %4372  ;;  %4386 = vpow2.f32 %v1344_v32 }
 0x39a   :  { %4108 = vmatpush3.bf16.msra.mxu1 %v5290_v58  ;;  %4388 = vpow2.f32 %v1354_v9 }
 0x39b   :  { %v4375_v50 = vpop.eup %4374  ;;  %4130 = vmatprep.subr.bf16.mxu1 %v5776_v59 }
 0x39c   :  { %v4377_v35 = vpop.eup %4376  ;;  %1525 = vmatprep.mubr.f32.mxu0 %v4375_v50 }
 0x39d   :  { %1526 = vmatmul.mubr.f32.gmra.mrb[34].mxu0 %v4377_v35  ;;  %3778 = vmatmul.mubr.f32.vlgmr.msra.gmra.mrb[40].mxu1 %v4373_v14 }
 0x39e   :  { %3780 = vmatprep.mubr.msk.f32.mxu1 %vm4525_vm8, %v5777_v4 }
 0x39f   :  { %v4379_v31 = vpop.eup %4378 }
 0x3a0   :  { %v4381_v54 = vpop.eup %4380  ;;  %1530 = vmatprep.mubr.f32.mxu0 %v4379_v31 }
 0x3a1   :  { %v4383_v30 = vpop.eup %4382  ;;  %1531 = vmatmul.mubr.f32.gmra.mrb[36].mxu0 %v4381_v54 }
 0x3a2   :  { %3781 = vmatmul.mubr.f32.gmra.mrb[42].mxu1 %v4383_v30  ;;  %3802 = vmatprep.mubr.msk.f32.mxu0 %vm4525_vm8, %v5777_v4  ;;  %v4385_v48 = vpop.eup %4384 }
 0x3a3   :  { %3783 = vmatprep.mubr.msk.f32.mxu1 %vm4525_vm8, %v5777_v4  ;;  %4133 = vmatpush3.bf16.xpose.msk.msra.mxu1 %vm4844_vm2, %v5778_v52  ;;  %v4387_v33 = vpop.eup %4386 }
 0x3a4   :  { %4134 = vmatprep.subr.bf16.mxu1 %v5776_v59  ;;  %v4389_v61 = vpop.eup %4388 }
 0x3a6   :  { %3784 = vmatmul.mubr.f32.gmra.mrb[44].mxu1 %v4385_v48 }
 0x3a7   :  { %3786 = vmatprep.mubr.msk.f32.mxu1 %vm4525_vm8, %v5777_v4 }
 0x3aa   :  { %3787 = vmatmul.mubr.f32.gmra.mrb[46].mxu1 %v4387_v33 }
 0x3ab   :  { %3789 = vmatprep.mubr.msk.f32.mxu1 %vm4525_vm8, %v5777_v4  ;;  %4137 = vmatpush3.bf16.xpose.msk.msra.mxu1 %vm4844_vm2, %v5779_v46 }
 0x3ac   :  { %4147 = vmatprep.subr.bf16.mxu1 %v4894_v25 }
 0x3ae   :  { %3790 = vmatmul.mubr.f32.gmra.mrb[48].mxu1 %v4389_v61 }
 0x3af   :  { %3841 = vmatprep.mubr.msk.f32.mxu1 %vm4525_vm8, %v5777_v4 }
 0x3b2   :  { %3842 = vmatmul.mubr.msk.f32.vlgmr.msra.gmra.mrb[50].mxu1 %vm67_vm0, %v4832_v49 }
 0x3b3   :  { %3844 = vmatprep.mubr.msk.f32.mxu1 %vm4525_vm8, %v5777_v4  ;;  %4149 = vmatpush1.bf16.msra.mxu1 %v4918_v15 }
 0x3b4   :  { %4151 = vmatprep.subr.bf16.mxu1 %v4925_v16 }
 0x3b6   :  { %3845 = vmatmul.mubr.msk.f32.gmra.mrb[52].mxu1 %vm67_vm0, %v4836_v10 }
 0x3b7   :  { %3847 = vmatprep.mubr.msk.f32.mxu1 %vm4525_vm8, %v5777_v4  ;;  %4153 = vmatpush1.bf16.msra.mxu1 %v4936_v20 }
 0x3b8   :  { %4161 = vmatprep.subr.bf16.mxu1 %v4946_v23 }
 0x3ba   :  { %3848 = vmatmul.mubr.msk.f32.gmra.mrb[54].mxu1 %vm67_vm0, %v4834_v51 }
 0x3bb   :  { %3850 = vmatprep.mubr.msk.f32.mxu1 %vm4525_vm8, %v5777_v4 }
 0x3be   :  { %3851 = vmatmul.mubr.msk.f32.gmra.mrb[56].mxu1 %vm67_vm0, %v4840_v11 }
 0x3bf   :  { %3853 = vmatprep.mubr.msk.f32.mxu1 %vm4525_vm8, %v5777_v4 }
 0x3c2   :  { %3854 = vmatmul.mubr.msk.f32.gmra.mrb[58].mxu1 %vm67_vm0, %v4838_v53 }
 0x3c3   :  { %2201 = vmatprep.mubr.f32.mxu1 %v5777_v4 }
 0x450   :  { %v3392_v49 = vpop.f32.mrb[30].mxu1 }
 0x451   :  { %v3393_v10 = vpop.f32.mrb[31].mxu1 }
 0x452   :  { %v3394_v56 = vadd.f32 %v3393_v10, %v3392_v49 }
 0x454   :  { %v3395_v18 = vpop.f32.mrb[32].mxu1 }
 0x455   :  { %v3396_v19 = vpop.f32.mrb[33].mxu1 }
 0x456   :  { %v3397_v51 = vadd.f32 %v3396_v19, %v3395_v18 }
 0x458   :  { %v3398_v0 = vpop.f32.mrb[34].mxu1 }
 0x459   :  { %v3399_v25 = vpop.f32.mrb[35].mxu1 }
 0x45a   :  { %v3400_v15 = vadd.f32 %v3399_v25, %v3398_v0 }
 0x45c   :  { %v3401_v16 = vpop.f32.mrb[36].mxu1 }
 0x45d   :  { %v3402_v20 = vpop.f32.mrb[37].mxu1 }
 0x45e   :  { %v3403_v11 = vadd.f32 %v3402_v20, %v3401_v16 }
 0x460   :  { %v3404_v23 = vpop.f32.mrb[38].mxu1 }
 0x461   :  { %v3405_v63 = vpop.f32.mrb[39].mxu1 }
 0x462   :  { %v3406_v6 = vadd.f32 %v3405_v63, %v3404_v23 }
 0x464   :  { %v3439_v22 = vpop.f32.mrb[28].mxu0 }
 0x465   :  { %v3440_v8 = vpop.f32.mrb[29].mxu0 }
 0x466   :  { %v3441_v53 = vadd.f32 %v3440_v8, %v3439_v22 }
 0x468   :  { %v3442_v60 = vpop.f32.mrb[30].mxu0  ;;  %v1513_v5 = vadd.f32 %v3441_v53, %v3394_v56  ;;  %v2020_v53 = vrot.slane %v4904_v27, %v5128_v29 }
 0x469   :  { %v3443_v17 = vpop.f32.mrb[31].mxu0 }
 0x46a   :  { %v3444_v14 = vadd.f32 %v3443_v17, %v3442_v60  ;;  %vm5344_vm11 = vcmp.eq.s32.totalorder %v2020_v53, 1  ;;  %v5785_v53 = vld [vmem:[#allocation7_spill] sm:$0xff] }
 0x46c   :  { %v3445_v50 = vpop.f32.mrb[32].mxu0  ;;  %v1518_v32 = vadd.f32 %v3444_v14, %v3397_v51 }
 0x46d   :  { %v3446_v36 = vpop.f32.mrb[33].mxu0 }
 0x46e   :  { %v3447_v35 = vadd.f32 %v3446_v36, %v3445_v50 }
 0x470   :  { %v3448_v31 = vpop.f32.mrb[34].mxu0  ;;  %v1523_v9 = vadd.f32 %v3447_v35, %v3400_v15  ;;  %v1602_v54 = vpop.f32.mrb[40].mxu1 }
 0x471   :  { %v3449_v30 = vpop.f32.mrb[35].mxu0  ;;  %v1603_v52 = vadd.f32 %v1602_v54, %v1513_v5  ;;  %v3779_v48 = vpop.f32.mrb[41].mxu1 }
 0x472   :  { %v3450_v33 = vadd.f32 %v3449_v30, %v3448_v31  ;;  %v710_v31 = vmul.u32 8, %v4901_v26 }
 0x473   :  { %v1626_v46 = vmax.f32 %v1603_v52, 1e-10  ;;  %v705_v52 = vld [vmem:[%s5741_s2] sm:$0x3] }
 0x474   :  { %v3451_v61 = vpop.f32.mrb[36].mxu0  ;;  %v1528_v49 = vadd.f32 %v3450_v33, %v3403_v11  ;;  %v711_v26 = vsub.s32 %v4754_v44, %v710_v31 }
 0x475   :  { %v1607_v10 = vpop.f32.mrb[42].mxu1  ;;  %v3452_v18 = vpop.f32.mrb[37].mxu0  ;;  %4390 = vlog2.f32 %v1626_v46 }
 0x476   :  { %v1608_v19 = vadd.f32 %v1607_v10, %v1518_v32  ;;  %v3782_v56 = vpop.f32.mrb[43].mxu1  ;;  %v3453_v0 = vadd.f32 %v3452_v18, %v3451_v61  ;;  %vm712_vm12 = vcmp.ge.s32.totalorder %v711_v26, 0  ;;  %vm713_vm13 = vcmp.lt.s32.totalorder %v711_v26, 8 }
 0x477   :  { %vm5382_vm14 = vmand %vm712_vm12, %vm713_vm13 }
 0x478   :  { %v1627_v25 = vmax.f32 %v1608_v19, 1e-10  ;;  %v1533_v51 = vadd.f32 %v3453_v0, %v3406_v6 }
 0x479   :  { %v1612_v16 = vpop.f32.mrb[44].mxu1 }
 0x47a   :  { %4392 = vlog2.f32 %v1627_v25  ;;  %v1613_v20 = vadd.f32 %v1612_v16, %v1523_v9  ;;  %v3785_v15 = vpop.f32.mrb[45].mxu1 }
 0x47c   :  { %v1628_v23 = vmax.f32 %v1613_v20, 1e-10 }
 0x47d   :  { %v1617_v63 = vpop.f32.mrb[46].mxu1 }
 0x47e   :  { %v1618_v22 = vadd.f32 %v1617_v63, %v1528_v49  ;;  %v3788_v8 = vpop.f32.mrb[47].mxu1  ;;  %4394 = vlog2.f32 %v1628_v23  ;;  %v5366_v49 = vmul.f32 0.01, %v705_v52  ;;  %v5401_v23 = vld [vmem:[%s5747_s8] sm:$0xff]  }
 0x47f   :  { %v4391_v5 = vpop.eup %4390  ;;  %v5784_v8 = vld [vmem:[#allocation6_spill] sm:$0xff] }
 0x480   :  { %v1629_v11 = vmax.f32 %v1618_v22, 1e-10  ;;  %v1632_v36 = vmul.f32 0.6931472, %v4391_v5  ;;  %v5419_v22 = vld [vmem:[%s5747_s8 + $0x8] sm:$0xff]  }
 0x481   :  { %v1622_v60 = vpop.f32.mrb[48].mxu1 }
 0x482   :  { %4396 = vlog2.f32 %v1629_v11  ;;  %v1623_v17 = vadd.f32 %v1622_v60, %v1533_v51  ;;  %v3791_v14 = vpop.f32.mrb[49].mxu1  ;;  %v5786_v11 = vld [vmem:[#allocation8_spill] sm:$0xff]  ;;  %v5787_v60 = vld [vmem:[#allocation9_spill] sm:$0xff] }
 0x484   :  { %v4393_v50 = vpop.eup %4392  ;;  %v1630_v32 = vmax.f32 %v1623_v17, 1e-10 }
 0x485   :  { %v1634_v35 = vmul.f32 0.6931472, %v4393_v50  ;;  %v1993_v9 = vpop.f32.mrb[50].mxu1 }
 0x486   :  { %4398 = vlog2.f32 %v1630_v32  ;;  %v5351_v54 = vsel %vm5344_vm11, %v1993_v9, 10000.0  ;;  %v3843_v30 = vpop.f32.mrb[51].mxu1 }
 0x487   :  { %v4110_v27 = vpack.c.bf16 %v1634_v35, %v1632_v36  ;;  %3074 = vmatmul.mubr.msk.f32.vlgmr.msra.gmra.mrb[60].mxu1 %vm67_vm0, %v5351_v54 }
 0x488   :  { %2207 = vmatprep.mubr.f32.mxu1 %v5777_v4  ;;  %v4395_v48 = vpop.eup %4394  ;;  %4163 = vmatpush3.bf16.msra.mxu1 %v4975_v39 }
 0x489   :  { %4111 = vmatpush3.bf16.msra.mxu0 %v4110_v27  ;;  %v1998_v33 = vpop.f32.mrb[52].mxu1  ;;  %4165 = vmatprep.subr.bf16.mxu1 %v4980_v40  ;;  %v1636_v44 = vmul.f32 0.6931472, %v4395_v48  ;;  %v1645_v40 = vrot.slane %v5366_v49, %v4907_v12 }
 0x48a   :  { %4112 = vmatprep.subr.bf16.mxu0 %v5776_v59  ;;  %v5364_v46 = vsel %vm5344_vm11, %v1998_v33, 10000.0  ;;  %v3846_v61 = vpop.f32.mrb[53].mxu1 }
 0x48b   :  { %3075 = vmatmul.mubr.msk.f32.gmra.mrb[62].mxu1 %vm67_vm0, %v5364_v46  ;;  %v1646_v15 = vsel %vm5382_vm14, %v1645_v40, 0.0  ;;  %v5485_v61 = vld [vmem:[%s5748_s9] sm:$0x1] }
 0x48c   :  { %v4397_v10 = vpop.eup %4396  ;;  %2213 = vmatprep.mubr.f32.mxu1 %v5777_v4  ;;  %4167 = vmatpush3.bf16.msra.mxu1 %v4989_v41  ;;  %v4478_v40 = vld [vmem:[%s5746_s7 + $0xc0] sm:$0xff]  }
 0x48d   :  { %v1638_v18 = vmul.f32 0.6931472, %v4397_v10  ;;  %v2003_v39 = vpop.f32.mrb[54].mxu1  ;;  %4169 = vmatprep.subr.bf16.mxu1 %v4994_v42  ;;  %v4472_v10 = vld [vmem:[%s5745_s6 + $0x4] ss:$20 sps:$4 sm:$0xff]  }
 0x48e   :  { %v5375_v56 = vsel %vm5344_vm11, %v2003_v39, 10000.0  ;;  %v3849_v0 = vpop.f32.mrb[55].mxu1  ;;  %v4475_v39 = vld [vmem:[%s5745_s6 + $0x28] ss:$20 sps:$4 sm:$0xff]  }
 0x48f   :  { %v4113_v19 = vpack.c.bf16 %v1638_v18, %v1636_v44  ;;  %3076 = vmatmul.mubr.msk.f32.gmra.mrb[64].mxu1 %vm67_vm0, %v5375_v56  ;;  %v4473_v44 = vld [vmem:[%s5745_s6] ss:$20 sps:$4 sm:$0xff]   ;;  %v4477_v0 = vld [vmem:[%s5745_s6 + $0x38] ss:$20 sps:$4 sm:$0xff]  }
 0x490   :  { %v4399_v25 = vpop.eup %4398  ;;  %2219 = vmatprep.mubr.f32.mxu1 %v5777_v4  ;;  %4171 = vmatpush3.bf16.msra.mxu1 %v5003_v43  ;;  %v4474_v18 = vld [vmem:[%s5745_s6 + $0x2c] ss:$20 sps:$4 sm:$0xff]  }
 0x491   :  { %4114 = vmatpush3.bf16.msra.mxu0 %v4113_v19  ;;  %v2008_v41 = vpop.f32.mrb[56].mxu1  ;;  %v1640_v16 = vmul.f32 0.6931472, %v4399_v25  ;;  %4173 = vmatprep.subr.bf16.mxu1 %v5014_v45  ;;  %v4476_v19 = vld [vmem:[%s5745_s6 + $0x10] ss:$20 sps:$4 sm:$0xff]  }
 0x492   :  { %3800 = vmatprep.subr.mxu0 %v5777_v4  ;;  %v5391_v42 = vsel %vm5344_vm11, %v2008_v41, 10000.0  ;;  %v3852_v20 = vpop.f32.mrb[57].mxu1 }
 0x493   :  { %3077 = vmatmul.mubr.msk.f32.gmra.mrb[66].mxu1 %vm67_vm0, %v5391_v42  ;;  %v4479_v20 = vld [vmem:[%s5746_s7 + $0x80] sm:$0xff]  }
 0x494   :  { %2225 = vmatprep.mubr.f32.mxu1 %v5777_v4  ;;  %4175 = vmatpush3.bf16.msra.mxu1 %v5020_v1  ;;  %v5436_v1 = vld [vmem:[%s5747_s8 + $0x10] sm:$0xff]  }
 0x495   :  { %3801 = vmatpush3.msra.mxu0 %v1640_v16  ;;  %v2013_v43 = vpop.f32.mrb[58].mxu1  ;;  %4177 = vmatprep.subr.bf16.mxu1 %v5026_v2  ;;  %v5443_v2 = vld [vmem:[%s5747_s8 + $0x18] sm:$0xff]  }
 0x496   :  { %3803 = vmatmul.mubr.msk.f32.vlgmr.msra.gmra.mrb[38].mxu0 %vm1647_vm15, %v1646_v15  ;;  %4115 = vmatprep.subr.bf16.mxu0 %v5776_v59  ;;  %v5408_v63 = vsel %vm5344_vm11, %v2013_v43, 10000.0  ;;  %v3855_v45 = vpop.f32.mrb[59].mxu1  ;;  %v4480_v43 = vld [vmem:[%s5746_s7 + $0xc8] sm:$0xff]  }
 0x497   :  { %4117 = vmatpush3.bf16.msra.mxu0 %v5401_v23  ;;  %3825 = vmatprep.mubr.msk.f32.mxu0 %vm4525_vm8, %v5777_v4 }
 0x498   :  { %3078 = vmatmul.mubr.msk.f32.gmra.mrb[68].mxu1 %vm67_vm0, %v5408_v63  ;;  %4118 = vmatprep.subr.bf16.mxu0 %v5776_v59 }
 0x499   :  { %4179 = vmatpush3.bf16.msra.mxu1 %v5032_v7  ;;  %v5450_v7 = vld [vmem:[%s5747_s8 + $0x20] sm:$0xff]  }
 0x49a   :  { %4181 = vmatprep.subr.bf16.mxu1 %v5038_v3  ;;  %v5457_v3 = vld [vmem:[%s5743_s4] sm:$0x3] }
 0x49b   :  { %4120 = vmatpush3.bf16.msra.mxu0 %v5419_v22  ;;  %4289 = vpush %v5457_v3 }
 0x49c   :  { %4121 = vmatprep.subr.bf16.mxu0 %v5776_v59 }
 0x49d   :  { %4183 = vmatpush3.bf16.msra.mxu1 %v5044_v47 }
 0x49e   :  { %4185 = vmatprep.subr.bf16.mxu1 %v5784_v8 }
 0x49f   :  { %4123 = vmatpush3.bf16.msra.mxu0 %v5436_v1 }
 0x4a0   :  { %4124 = vmatprep.subr.bf16.mxu0 %v5776_v59 }
 0x4a1   :  { %4187 = vmatpush3.bf16.msra.mxu1 %v5785_v53  ;;  %v4482_v53 = vld [vmem:[%s5746_s7 + $0xd0] sm:$0xff]  }
 0x4a2   :  { %4189 = vmatprep.subr.bf16.mxu1 %v5786_v11 }
 0x4a3   :  { %4126 = vmatpush3.bf16.msra.mxu0 %v5443_v2 }
 0x4a4   :  { %4127 = vmatprep.subr.bf16.mxu0 %v5776_v59 }
 0x4a5   :  { %4191 = vmatpush3.bf16.msra.mxu1 %v5787_v60  ;;  %v4483_v60 = vld [vmem:[%s5746_s7 + $0x90] sm:$0xff]  }
 0x4a6   :  { %4224 = vmatprep.subr.bf16.mxu1 %v5776_v59 }
 0x4a7   :  { %4129 = vmatpush3.bf16.msra.mxu0 %v5450_v7 }
 0x4a8   :  { %3828 = vmatprep.subr.mxu0 %v5777_v4 }
 0x4cc   :  { %s4290_s4 = spop %4289 }
 0x4cd   :  { %v1797_v30 = vstv %s4290_s4 }
 0x55a   :  { %v5460_v47 = vpop.f32.mrb[60].mxu1 }
 0x55b   :  { %v2205_v5 = vpop.f32.mrb[61].mxu1  ;;  %v2324_v45 = vsub.f32 %v5460_v47, %v5189_v55 }
 0x55c   :  { %v2325_v25 = vsub.f32 %v2205_v5, %v5195_v38 }
 0x55d   :  { %v2349_v11 = vmul.f32 %v2324_v45, %v2324_v45 }
 0x55e   :  { %v5462_v17 = vpop.f32.mrb[62].mxu1  ;;  %v2350_v41 = vmul.f32 %v2325_v25, %v2325_v25 }
 0x55f   :  { %v5464_v14 = vpop.f32.mrb[63].mxu1 }
 0x560   :  { %v2375_v16 = vmul.f32 %v2350_v41, %v5212_v21  ;;  %v2330_v8 = vsub.f32 %v5464_v14, %v5195_v38  ;;  %v4484_v14 = vld [vmem:[%s5746_s7 + $0xd8] sm:$0xff]   ;;  %v4489_v41 = vld [vmem:[%s5746_s7 + $0xa8] sm:$0xff]  }
 0x562   :  { %v5466_v50 = vpop.f32.mrb[64].mxu1  ;;  %v2403_v15 = vmul.f32 1.442695, %v2375_v16  ;;  %v2355_v47 = vmul.f32 %v2330_v8, %v2330_v8  ;;  %v4492_v8 = vld [vmem:[%s5746_s7 + $0xf8] sm:$0xff]  }
 0x563   :  { %v5468_v6 = vpop.f32.mrb[65].mxu1 }
 0x564   :  { %v2335_v5 = vsub.f32 %v5468_v6, %v5195_v38  ;;  %v2380_v6 = vmul.f32 %v2355_v47, %v5212_v21 }
 0x566   :  { %v5470_v32 = vpop.f32.mrb[66].mxu1 }
 0x567   :  { %v5472_v36 = vpop.f32.mrb[67].mxu1 }
 0x569   :  { %v1717_v35 = vpop.f32.mrb[38].mxu0 }
 0x56a   :  { %v3804_v31 = vpop.f32.mrb[39].mxu0  ;;  %3826 = vmatmul.mubr.msk.f32.vlgmr.msra.gmra.mrb[40].mxu0 %vm1721_vm1, %v1717_v35  ;;  %v2334_v35 = vsub.f32 %v5466_v50, %v5189_v55 }
 0x56b   :  { %v5475_v9 = vpop.f32.mrb[68].mxu1  ;;  %3830 = vmatprep.mubr.msk.f32.mxu0 %vm4525_vm8, %v5777_v4  ;;  %v4485_v31 = vld [vmem:[%s5746_s7 + $0x98] sm:$0xff]  }
 0x56c   :  { %v5479_v27 = vpop.f32.mrb[69].mxu1  ;;  %v2344_v25 = vsub.f32 %v5475_v9, %v5189_v55  ;;  %v4491_v9 = vld [vmem:[%s5746_s7 + $0xb0] sm:$0xff]  }
 0x63d   :  { %v1791_v52 = vpop.f32.mrb[40].mxu0 }
 0x63e   :  { %v1799_v26 = vmul.f32 %v1797_v30, %v1791_v52  ;;  %v3827_v48 = vpop.f32.mrb[41].mxu0  ;;  %v2360_v30 = vmul.f32 %v2335_v5, %v2335_v5  ;;  %v2340_v52 = vsub.f32 %v5472_v36, %v5195_v38  ;;  %v4487_v36 = vld [vmem:[%s5746_s7 + $0xa0] sm:$0xff]  }
 0x640   :  { %4400 = vtanh.f32 %v1799_v26 }
 0x641   :  { %4402 = vpow2.f32 %v2403_v15 }
 0x64a   :  { %v4401_v33 = vpop.eup %4400 }
 0x64b   :  { %3829 = vmatpush3.xpose.msk.msra.mxu0 %vm1810_vm3, %v4401_v33  ;;  %v4403_v50 = vpop.eup %4402  ;;  %v2359_v33 = vmul.f32 %v2334_v35, %v2334_v35 }
 0x64c   :  { %4139 = vmatprep.subr.bf16.mxu0 %v4472_v10  ;;  %v2339_v10 = vsub.f32 %v5470_v32, %v5189_v55 }
 0x64e   :  { %3831 = vmatmul.mubr.msk.f32.vlgmr.msra.gmra.mrb[42].mxu0 %vm1810_vm3, %v5485_v61 }
 0x64f   :  { %4141 = vmatpush1.bf16.msra.mxu0 %v4473_v44  ;;  %2106 = vmatprep.mubr.f32.mxu0 %v5777_v4  ;;  %v2413_v44 = vmul.f32 1.442695, %v2380_v6 }
 0x650   :  { %4143 = vmatprep.subr.bf16.mxu0 %v4474_v18  ;;  %v2385_v18 = vmul.f32 %v2360_v30, %v5212_v21  ;;  %v1804_v30 = vpop.permute.xlu0 %1803 }
 0x653   :  { %4145 = vmatpush1.bf16.msra.mxu0 %v4475_v39  ;;  %v2365_v39 = vmul.f32 %v2340_v52, %v2340_v52  ;;  %v5625_v52 = vrot.slane %v1804_v30, %v4907_v12 }
 0x654   :  { %4154 = vmatprep.subr.bf16.mxu0 %v5776_v59 }
 0x656   :  { %3069 = vmatmul.mubr.msk.f32.vlgmr.msra.gmra.mrb[44].mxu0 %vm67_vm0, %v5351_v54 }
 0x657   :  { %2112 = vmatprep.mubr.f32.mxu0 %v5777_v4  ;;  %4156 = vmatpush3.bf16.msra.mxu0 %v4476_v19  ;;  %v2345_v19 = vsub.f32 %v5479_v27, %v5195_v38  ;;  %v2423_v38 = vmul.f32 1.442695, %v2385_v18  ;;  %v2390_v27 = vmul.f32 %v2365_v39, %v5212_v21 }
 0x658   :  { %4157 = vmatprep.subr.bf16.mxu0 %v5776_v59 }
 0x659   :  { %v2370_v16 = vmul.f32 %v2345_v19, %v2345_v19  ;;  %v2433_v45 = vmul.f32 1.442695, %v2390_v27 }
 0x65a   :  { %3070 = vmatmul.mubr.msk.f32.gmra.mrb[46].mxu0 %vm67_vm0, %v5364_v46 }
 0x65b   :  { %2118 = vmatprep.mubr.f32.mxu0 %v5777_v4  ;;  %4159 = vmatpush3.bf16.msra.mxu0 %v4477_v0  ;;  %v2384_v0 = vmul.f32 %v2359_v33, %v5204_v62 }
 0x65c   :  { %4193 = vmatprep.subr.bf16.mxu0 %v4478_v40  ;;  %v2364_v40 = vmul.f32 %v2339_v10, %v2339_v10  ;;  %v5788_v10 = vld [vmem:[#allocation10_spill] sm:$0xff] }
 0x65d   :  { %v2421_v15 = vmul.f32 1.442695, %v2384_v0 }
 0x65e   :  { %3071 = vmatmul.mubr.msk.f32.gmra.mrb[48].mxu0 %vm67_vm0, %v5375_v56 }
 0x65f   :  { %2124 = vmatprep.mubr.f32.mxu0 %v5777_v4 }
 0x662   :  { %3072 = vmatmul.mubr.msk.f32.gmra.mrb[50].mxu0 %vm67_vm0, %v5391_v42 }
 0x663   :  { %2130 = vmatprep.mubr.f32.mxu0 %v5777_v4 }
 0x666   :  { %3073 = vmatmul.mubr.msk.f32.gmra.mrb[52].mxu0 %vm67_vm0, %v5408_v63 }
 0x667   :  { %3864 = vmatprep.mubr.msk.f32.mxu0 %vm4525_vm8, %v5777_v4 }
 0x66a   :  { %3865 = vmatmul.mubr.msk.f32.vlgmr.msra.gmra.mrb[54].mxu0 %vm67_vm0, %v5351_v54  ;;  %v4481_v54 = vld [vmem:[%s5746_s7 + $0x88] sm:$0xff]  }
 0x66b   :  { %4195 = vmatpush3.bf16.msra.mxu0 %v4479_v20  ;;  %3867 = vmatprep.mubr.msk.f32.mxu0 %vm4525_vm8, %v5777_v4  ;;  %v4490_v20 = vld [vmem:[%s5746_s7 + $0xf0] sm:$0xff]  }
 0x66c   :  { %4197 = vmatprep.subr.bf16.mxu0 %v4480_v43  ;;  %v2389_v43 = vmul.f32 %v2364_v40, %v5204_v62 }
 0x66e   :  { %3868 = vmatmul.mubr.msk.f32.gmra.mrb[56].mxu0 %vm67_vm0, %v5364_v46  ;;  %v2329_v46 = vsub.f32 %v5462_v17, %v5189_v55  ;;  %v2369_v55 = vmul.f32 %v2344_v25, %v2344_v25  ;;  %v5790_v25 = vld [vmem:[#allocation12_spill] sm:$0xff] }
 0x66f   :  { %4199 = vmatpush3.bf16.msra.mxu0 %v4481_v54  ;;  %3870 = vmatprep.mubr.msk.f32.mxu0 %vm4525_vm8, %v5777_v4  ;;  %v2395_v54 = vmul.f32 %v2370_v16, %v5212_v21 }
 0x670   :  { %4201 = vmatprep.subr.bf16.mxu0 %v4482_v53  ;;  %v2354_v17 = vmul.f32 %v2329_v46, %v2329_v46  ;;  %v2431_v53 = vmul.f32 1.442695, %v2389_v43  ;;  %v4493_v46 = vld [vmem:[%s5746_s7 + $0xb8] sm:$0xff]  }
 0x671   :  { %v2443_v47 = vmul.f32 1.442695, %v2395_v54 }
 0x672   :  { %3871 = vmatmul.mubr.msk.f32.gmra.mrb[58].mxu0 %vm67_vm0, %v5375_v56  ;;  %v2374_v56 = vmul.f32 %v2349_v11, %v5204_v62  ;;  %v2379_v48 = vmul.f32 %v2354_v17, %v5204_v62  ;;  %v2394_v11 = vmul.f32 %v2369_v55, %v5204_v62 }
 0x673   :  { %4203 = vmatpush3.bf16.msra.mxu0 %v4483_v60  ;;  %3873 = vmatprep.mubr.msk.f32.mxu0 %vm4525_vm8, %v5777_v4 }
 0x674   :  { %4205 = vmatprep.subr.bf16.mxu0 %v4484_v14  ;;  %v2401_v26 = vmul.f32 1.442695, %v2374_v56  ;;  %v2411_v32 = vmul.f32 1.442695, %v2379_v48  ;;  %v2441_v5 = vmul.f32 1.442695, %v2394_v11 }
 0x676   :  { %3874 = vmatmul.mubr.msk.f32.gmra.mrb[60].mxu0 %vm67_vm0, %v5391_v42  ;;  %v4486_v42 = vld [vmem:[%s5746_s7 + $0xe0] sm:$0xff]   ;;  %4404 = vpow2.f32 %v2401_v26 }
 0x677   :  { %4207 = vmatpush3.bf16.msra.mxu0 %v4485_v31  ;;  %3876 = vmatprep.mubr.msk.f32.mxu0 %vm4525_vm8, %v5777_v4  ;;  %4406 = vpow2.f32 %v2413_v44 }
 0x678   :  { %4209 = vmatprep.subr.bf16.mxu0 %v4486_v42  ;;  %4408 = vpow2.f32 %v2411_v32 }
 0x679   :  { %4410 = vpow2.f32 %v2423_v38 }
 0x67a   :  { %3877 = vmatmul.mubr.msk.f32.gmra.mrb[62].mxu0 %vm67_vm0, %v5408_v63  ;;  %v4488_v63 = vld [vmem:[%s5746_s7 + $0xe8] sm:$0xff]   ;;  %4412 = vpow2.f32 %v2421_v15  ;;  %vm1887_vm0 = vcmask 32768  }
 0x67b   :  { %4211 = vmatpush3.bf16.msra.mxu0 %v4487_v36  ;;  %2601 = vmatprep.mubr.f32.mxu0 %v4403_v50  ;;  %4414 = vpow2.f32 %v2433_v45 }
 0x67c   :  { %4213 = vmatprep.subr.bf16.mxu0 %v4488_v63  ;;  %4416 = vpow2.f32 %v2431_v53  ;;  %v5789_v63 = vld [vmem:[#allocation11_spill] sm:$0xff] }
 0x67d   :  { %4418 = vpow2.f32 %v2443_v47 }
 0x67e   :  { %4420 = vpow2.f32 %v2441_v5 }
 0x67f   :  { %4215 = vmatpush3.bf16.msra.mxu0 %v4489_v41 }
 0x680   :  { %4217 = vmatprep.subr.bf16.mxu0 %v4490_v20  ;;  %v4405_v60 = vpop.eup %4404 }
 0x681   :  { %v4407_v21 = vpop.eup %4406 }
 0x682   :  { %v4409_v14 = vpop.eup %4408 }
 0x683   :  { %4219 = vmatpush3.bf16.msra.mxu0 %v4491_v9  ;;  %v4411_v56 = vpop.eup %4410 }
 0x684   :  { %4221 = vmatprep.subr.bf16.mxu0 %v4492_v8  ;;  %v4413_v62 = vpop.eup %4412 }
 0x685   :  { %v4415_v17 = vpop.eup %4414 }
 0x686   :  { %v4417_v35 = vpop.eup %4416 }
 0x687   :  { %4223 = vmatpush3.bf16.msra.mxu0 %v4493_v46  ;;  %v4419_v31 = vpop.eup %4418 }
 0x688   :  { %4248 = vmatprep.subr.bf16.mxu0 %v5776_v59  ;;  %v4421_v6 = vpop.eup %4420 }
 0x68a   :  { %2602 = vmatmul.mubr.f32.vlgmr.msra.gmra.mrb[64].mxu0 %v4405_v60 }
 0x68b   :  { %2606 = vmatprep.mubr.f32.mxu0 %v4407_v21 }
 0x68e   :  { %2607 = vmatmul.mubr.f32.gmra.mrb[66].mxu0 %v4409_v14 }
 0x68f   :  { %2611 = vmatprep.mubr.f32.mxu0 %v4411_v56 }
 0x692   :  { %2612 = vmatmul.mubr.f32.gmra.mrb[68].mxu0 %v4413_v62 }
 0x693   :  { %2616 = vmatprep.mubr.f32.mxu0 %v4415_v17 }
 0x696   :  { %2617 = vmatmul.mubr.f32.gmra.mrb[70].mxu0 %v4417_v35 }
 0x697   :  { %2621 = vmatprep.mubr.f32.mxu0 %v4419_v31 }
 0x69a   :  { %2622 = vmatmul.mubr.f32.gmra.mrb[72].mxu0 %v4421_v6 }
 0x69b   :  { %3936 = vmatprep.mubr.msk.f32.mxu0 %vm4525_vm8, %v5777_v4 }
 0x721   :  { %v1883_v42 = vpop.f32.mrb[42].mxu0 }
 0x722   :  { %v5628_v50 = vadd.f32 %v1883_v42, %v5625_v52  ;;  %v3832_v26 = vpop.f32.mrb[43].mxu0 }
 0x724   :  { %v1888_v48 = vsel %vm1887_vm0, %v5628_v50, -inf }
 0x725   :  { %1889 = vmax.xlane.f32.xlu0 %v1888_v48 }
 0x729   :  { %v2108_v33 = vpop.f32.mrb[44].mxu0 }
 0x72a   :  { %v2322_v36 = vsub.f32 %v2108_v33, %v5788_v10  ;;  %v2110_v44 = vpop.f32.mrb[45].mxu0 }
 0x72b   :  { %v2323_v18 = vsub.f32 %v2110_v44, %v5140_v37 }
 0x72c   :  { %v2347_v39 = vmul.f32 %v2322_v36, %v2322_v36 }
 0x72d   :  { %v2348_v19 = vmul.f32 %v2323_v18, %v2323_v18  ;;  %v2114_v12 = vpop.f32.mrb[46].mxu0 }
 0x72e   :  { %v2372_v32 = vmul.f32 %v2347_v39, %v5789_v63  ;;  %v2327_v0 = vsub.f32 %v2114_v12, %v5788_v10  ;;  %v2116_v40 = vpop.f32.mrb[47].mxu0 }
 0x72f   :  { %v2373_v41 = vmul.f32 %v2348_v19, %v5790_v25  ;;  %v2328_v38 = vsub.f32 %v2116_v40, %v5140_v37 }
 0x730   :  { %v2397_v27 = vmul.f32 1.442695, %v2372_v32  ;;  %v2352_v16 = vmul.f32 %v2327_v0, %v2327_v0 }
 0x731   :  { %v2399_v20 = vmul.f32 1.442695, %v2373_v41  ;;  %v2353_v15 = vmul.f32 %v2328_v38, %v2328_v38  ;;  %v2120_v43 = vpop.f32.mrb[48].mxu0 }
 0x732   :  { %v2377_v55 = vmul.f32 %v2352_v16, %v5789_v63  ;;  %v2332_v9 = vsub.f32 %v2120_v43, %v5788_v10  ;;  %v2122_v45 = vpop.f32.mrb[49].mxu0 }
 0x733   :  { %4422 = vpow2.f32 %v2399_v20  ;;  %v2378_v54 = vmul.f32 %v2353_v15, %v5790_v25  ;;  %v2333_v8 = vsub.f32 %v2122_v45, %v5140_v37 }
 0x734   :  { %4424 = vpow2.f32 %v2397_v27  ;;  %v2407_v53 = vmul.f32 1.442695, %v2377_v55  ;;  %v2357_v11 = vmul.f32 %v2332_v9, %v2332_v9 }
 0x735   :  { %v2409_v46 = vmul.f32 1.442695, %v2378_v54  ;;  %v2358_v60 = vmul.f32 %v2333_v8, %v2333_v8  ;;  %v2126_v47 = vpop.f32.mrb[50].mxu0 }
 0x736   :  { %v2382_v21 = vmul.f32 %v2357_v11, %v5789_v63  ;;  %v2337_v5 = vsub.f32 %v2126_v47, %v5788_v10  ;;  %v2128_v14 = vpop.f32.mrb[51].mxu0  ;;  %v4496_v11 = vld [vmem:[%s5746_s7 + $0x110] sm:$0xff]  }
 0x737   :  { %4426 = vpow2.f32 %v2409_v46  ;;  %v2383_v56 = vmul.f32 %v2358_v60, %v5790_v25  ;;  %v2338_v62 = vsub.f32 %v2128_v14, %v5140_v37 }
 0x738   :  { %4428 = vpow2.f32 %v2407_v53  ;;  %v2417_v17 = vmul.f32 1.442695, %v2382_v21  ;;  %v2362_v35 = vmul.f32 %v2337_v5, %v2337_v5 }
 0x739   :  { %v2419_v31 = vmul.f32 1.442695, %v2383_v56  ;;  %v2363_v6 = vmul.f32 %v2338_v62, %v2338_v62  ;;  %v2132_v30 = vpop.f32.mrb[52].mxu0  ;;  %v4497_v62 = vld [vmem:[%s5746_s7 + $0x118] sm:$0xff]  }
 0x73a   :  { %v2387_v42 = vmul.f32 %v2362_v35, %v5789_v63  ;;  %v2342_v26 = vsub.f32 %v2132_v30, %v5788_v10  ;;  %v2134_v48 = vpop.f32.mrb[53].mxu0 }
 0x73b   :  { %4430 = vpow2.f32 %v2419_v31  ;;  %v2388_v33 = vmul.f32 %v2363_v6, %v5790_v25  ;;  %v2343_v36 = vsub.f32 %v2134_v48, %v5140_v37  ;;  %v4494_v37 = vld [vmem:[%s5746_s7 + $0x100] sm:$0xff]  }
 0x73c   :  { %4432 = vpow2.f32 %v2417_v17  ;;  %v2427_v44 = vmul.f32 1.442695, %v2387_v42  ;;  %v2367_v18 = vmul.f32 %v2342_v26, %v2342_v26 }
 0x73d   :  { %v4423_v39 = vpop.eup %4422  ;;  %v2429_v19 = vmul.f32 1.442695, %v2388_v33  ;;  %v2368_v12 = vmul.f32 %v2343_v36, %v2343_v36  ;;  %v2298_v32 = vpop.f32.mrb[54].mxu0 }
 0x73e   :  { %v4425_v0 = vpop.eup %4424  ;;  %v2392_v40 = vmul.f32 %v2367_v18, %v5789_v63  ;;  %v3866_v41 = vpop.f32.mrb[55].mxu0  ;;  %2511 = vmatprep.mubr.f32.mxu1 %v4423_v39  ;;  %v2326_v43 = vsub.f32 %v2298_v32, %v5199_v34 }
 0x73f   :  { %4434 = vpow2.f32 %v2429_v19  ;;  %v2393_v10 = vmul.f32 %v2368_v12, %v5790_v25  ;;  %2512 = vmatmul.mubr.f32.vlgmr.msra.gmra.mrb[70].mxu1 %v4425_v0  ;;  %v4495_v25 = vld [vmem:[%s5746_s7 + $0x108] sm:$0xff]  }
 0x740   :  { %4436 = vpow2.f32 %v2427_v44  ;;  %v2437_v38 = vmul.f32 1.442695, %v2392_v40  ;;  %4226 = vmatpush3.bf16.msra.mxu1 %v4494_v37  ;;  %v2351_v8 = vmul.f32 %v2326_v43, %v2326_v43 }
 0x741   :  { %v4427_v27 = vpop.eup %4426  ;;  %v2439_v16 = vmul.f32 1.442695, %v2393_v10  ;;  %v2303_v20 = vpop.f32.mrb[56].mxu0  ;;  %4227 = vmatprep.subr.bf16.mxu1 %v5776_v59 }
 0x742   :  { %v4429_v15 = vpop.eup %4428  ;;  %v3869_v63 = vpop.f32.mrb[57].mxu0  ;;  %2516 = vmatprep.mubr.f32.mxu1 %v4427_v27  ;;  %v2331_v53 = vsub.f32 %v2303_v20, %v5199_v34  ;;  %v2376_v5 = vmul.f32 %v2351_v8, %v5227_v24 }
 0x743   :  { %4438 = vpow2.f32 %v2439_v16  ;;  %2517 = vmatmul.mubr.f32.gmra.mrb[72].mxu1 %v4429_v15 }
 0x744   :  { %4440 = vpow2.f32 %v2437_v38  ;;  %4229 = vmatpush3.bf16.msra.mxu1 %v4495_v25  ;;  %v2356_v14 = vmul.f32 %v2331_v53, %v2331_v53  ;;  %v2405_v30 = vmul.f32 1.442695, %v2376_v5 }
 0x745   :  { %v4431_v55 = vpop.eup %4430  ;;  %v2308_v9 = vpop.f32.mrb[58].mxu0  ;;  %4230 = vmatprep.subr.bf16.mxu1 %v5776_v59 }
 0x746   :  { %v4433_v45 = vpop.eup %4432  ;;  %v3872_v54 = vpop.f32.mrb[59].mxu0  ;;  %2521 = vmatprep.mubr.f32.mxu1 %v4431_v55  ;;  %v2336_v56 = vsub.f32 %v2308_v9, %v5199_v34  ;;  %v2381_v42 = vmul.f32 %v2356_v14, %v5227_v24  ;;  %4442 = vpow2.f32 %v2405_v30 }
 0x747   :  { %2522 = vmatmul.mubr.f32.gmra.mrb[74].mxu1 %v4433_v45 }
 0x748   :  { %4232 = vmatpush3.bf16.msra.mxu1 %v4496_v11  ;;  %v2361_v26 = vmul.f32 %v2336_v56, %v2336_v56  ;;  %v2415_v33 = vmul.f32 1.442695, %v2381_v42 }
 0x749   :  { %v4435_v46 = vpop.eup %4434  ;;  %v2313_v60 = vpop.f32.mrb[60].mxu0  ;;  %4233 = vmatprep.subr.bf16.mxu1 %v5776_v59 }
 0x74a   :  { %v4437_v47 = vpop.eup %4436  ;;  %v3875_v21 = vpop.f32.mrb[61].mxu0  ;;  %2526 = vmatprep.mubr.f32.mxu1 %v4435_v46  ;;  %v2341_v48 = vsub.f32 %v2313_v60, %v5199_v34  ;;  %v2386_v36 = vmul.f32 %v2361_v26, %v5227_v24  ;;  %4444 = vpow2.f32 %v2415_v33 }
 0x74b   :  { %2527 = vmatmul.mubr.f32.gmra.mrb[76].mxu1 %v4437_v47 }
 0x74c   :  { %4235 = vmatpush3.bf16.msra.mxu1 %v4497_v62  ;;  %v2366_v44 = vmul.f32 %v2341_v48, %v2341_v48  ;;  %v2425_v39 = vmul.f32 1.442695, %v2386_v36 }
 0x74d   :  { %v4439_v17 = vpop.eup %4438  ;;  %v2318_v35 = vpop.f32.mrb[62].mxu0  ;;  %4236 = vmatprep.subr.bf16.mxu1 %v5776_v59 }
 0x74e   :  { %v4441_v31 = vpop.eup %4440  ;;  %v3878_v6 = vpop.f32.mrb[63].mxu0  ;;  %2531 = vmatprep.mubr.f32.mxu1 %v4439_v17  ;;  %v2346_v18 = vsub.f32 %v2318_v35, %v5199_v34  ;;  %4446 = vpow2.f32 %v2425_v39 }
 0x74f   :  { %2532 = vmatmul.mubr.f32.gmra.mrb[78].mxu1 %v4441_v31 }
 0x750   :  { %4238 = vmatpush3.bf16.msra.mxu1 %v5256_v13  ;;  %3911 = vmatprep.mubr.msk.f32.mxu1 %vm4525_vm8, %v5777_v4  ;;  %v2391_v13 = vmul.f32 %v2366_v44, %v5227_v24  ;;  %v2371_v19 = vmul.f32 %v2346_v18, %v2346_v18  ;;  %v4443_v34 = vpop.eup %4442 }
 0x751   :  { %4239 = vmatprep.subr.bf16.mxu1 %v5776_v59 }
 0x752   :  { %v2435_v12 = vmul.f32 1.442695, %v2391_v13  ;;  %v2396_v32 = vmul.f32 %v2371_v19, %v5227_v24 }
 0x754   :  { %4241 = vmatpush3.bf16.msra.mxu1 %v5271_v28  ;;  %4448 = vpow2.f32 %v2435_v12  ;;  %v2445_v41 = vmul.f32 1.442695, %v2396_v32 }
 0x755   :  { %4242 = vmatprep.subr.bf16.mxu1 %v5776_v59 }
 0x756   :  { %4450 = vpow2.f32 %v2445_v41 }
 0x758   :  { %4244 = vmatpush3.bf16.msra.mxu1 %v5282_v57  ;;  %v4445_v57 = vpop.eup %4444 }
 0x759   :  { %4245 = vmatprep.subr.bf16.mxu1 %v5776_v59 }
 0x75c   :  { %4247 = vmatpush3.bf16.msra.mxu1 %v5290_v58  ;;  %v4447_v58 = vpop.eup %4446 }
 0x75d   :  { %v3591_v0 = vpop.f32.mrb[64].mxu0 }
 0x75e   :  { %v3592_v28 = vpop.f32.mrb[65].mxu0  ;;  %v4449_v15 = vpop.eup %4448 }
 0x75f   :  { %v3593_v40 = vadd.f32 %v3592_v28, %v3591_v0  ;;  %3912 = vmatmul.mubr.f32.vlgmr.msra.gmra.mrb[80].mxu1 %v4443_v34 }
 0x760   :  { %3914 = vmatprep.mubr.msk.f32.mxu1 %vm4525_vm8, %v5777_v4  ;;  %v4451_v55 = vpop.eup %4450 }
 0x761   :  { %v3594_v10 = vpop.f32.mrb[66].mxu0 }
 0x762   :  { %v3595_v38 = vpop.f32.mrb[67].mxu0 }
 0x763   :  { %v3596_v37 = vadd.f32 %v3595_v38, %v3594_v10  ;;  %3915 = vmatmul.mubr.f32.gmra.mrb[82].mxu1 %v4445_v57 }
 0x764   :  { %3917 = vmatprep.mubr.msk.f32.mxu1 %vm4525_vm8, %v5777_v4 }
 0x765   :  { %v3597_v24 = vpop.f32.mrb[68].mxu0 }
 0x766   :  { %v3598_v27 = vpop.f32.mrb[69].mxu0 }
 0x767   :  { %v3599_v16 = vadd.f32 %v3598_v27, %v3597_v24  ;;  %3918 = vmatmul.mubr.f32.gmra.mrb[84].mxu1 %v4447_v58 }
 0x768   :  { %3920 = vmatprep.mubr.msk.f32.mxu1 %vm4525_vm8, %v5777_v4 }
 0x769   :  { %v3600_v20 = vpop.f32.mrb[70].mxu0 }
 0x76a   :  { %v3601_v63 = vpop.f32.mrb[71].mxu0 }
 0x76b   :  { %v3602_v43 = vadd.f32 %v3601_v63, %v3600_v20  ;;  %3921 = vmatmul.mubr.f32.gmra.mrb[86].mxu1 %v4449_v15 }
 0x76c   :  { %3923 = vmatprep.mubr.msk.f32.mxu1 %vm4525_vm8, %v5777_v4 }
 0x76d   :  { %v3603_v25 = vpop.f32.mrb[72].mxu0 }
 0x76e   :  { %v3604_v9 = vpop.f32.mrb[73].mxu0 }
 0x76f   :  { %v3605_v45 = vadd.f32 %v3604_v9, %v3603_v25  ;;  %3924 = vmatmul.mubr.f32.gmra.mrb[88].mxu1 %v4451_v55 }
 0x812   :  { %v3544_v54 = vpop.f32.mrb[70].mxu1 }
 0x813   :  { %v3545_v8 = vpop.f32.mrb[71].mxu1 }
 0x814   :  { %v3546_v53 = vadd.f32 %v3545_v8, %v3544_v54  ;;  %v2735_v54 = vrot.slane %v5366_v49, %v5128_v29  ;;  %v2883_v29 = vrot.slane %v5457_v3, 1 }
 0x816   :  { %v3547_v11 = vpop.f32.mrb[72].mxu1  ;;  %v2604_v46 = vadd.f32 %v3593_v40, %v3546_v53  ;;  %4291 = vpush %v2883_v29 }
 0x817   :  { %v3548_v60 = vpop.f32.mrb[73].mxu1 }
 0x818   :  { %v3549_v47 = vadd.f32 %v3548_v60, %v3547_v11  ;;  %v2736_v11 = vsel %vm5382_vm14, %v2735_v54, 0.0 }
 0x81a   :  { %v3550_v21 = vpop.f32.mrb[74].mxu1  ;;  %v2609_v5 = vadd.f32 %v3596_v37, %v3549_v47 }
 0x81b   :  { %v3551_v14 = vpop.f32.mrb[75].mxu1 }
 0x81c   :  { %v3552_v56 = vadd.f32 %v3551_v14, %v3550_v21 }
 0x81e   :  { %v3553_v62 = vpop.f32.mrb[76].mxu1  ;;  %v2614_v17 = vadd.f32 %v3599_v16, %v3552_v56 }
 0x81f   :  { %v3554_v35 = vpop.f32.mrb[77].mxu1 }
 0x820   :  { %v3555_v31 = vadd.f32 %v3554_v35, %v3553_v62 }
 0x822   :  { %v3556_v6 = vpop.f32.mrb[78].mxu1  ;;  %v2619_v30 = vadd.f32 %v3602_v43, %v3555_v31 }
 0x823   :  { %v3557_v42 = vpop.f32.mrb[79].mxu1 }
 0x824   :  { %v3558_v26 = vadd.f32 %v3557_v42, %v3556_v6 }
 0x826   :  { %v2624_v48 = vadd.f32 %v3605_v45, %v3558_v26 }
 0x832   :  { %v2693_v33 = vpop.f32.mrb[80].mxu1 }
 0x833   :  { %v2694_v36 = vadd.f32 %v2693_v33, %v2604_v46  ;;  %v3913_v44 = vpop.f32.mrb[81].mxu1 }
 0x835   :  { %v2717_v18 = vmax.f32 %v2694_v36, 1e-10 }
 0x836   :  { %v2698_v39 = vpop.f32.mrb[82].mxu1 }
 0x837   :  { %v2699_v13 = vadd.f32 %v2698_v39, %v2609_v5  ;;  %v3916_v19 = vpop.f32.mrb[83].mxu1  ;;  %4452 = vlog2.f32 %v2717_v18 }
 0x839   :  { %v2718_v12 = vmax.f32 %v2699_v13, 1e-10 }
 0x83a   :  { %v2703_v32 = vpop.f32.mrb[84].mxu1 }
 0x83b   :  { %4454 = vlog2.f32 %v2718_v12  ;;  %v2704_v34 = vadd.f32 %v2703_v32, %v2614_v17  ;;  %v3919_v0 = vpop.f32.mrb[85].mxu1 }
 0x83d   :  { %v2719_v28 = vmax.f32 %v2704_v34, 1e-10 }
 0x83e   :  { %v2708_v40 = vpop.f32.mrb[86].mxu1 }
 0x83f   :  { %v2709_v41 = vadd.f32 %v2708_v40, %v2619_v30  ;;  %v3922_v10 = vpop.f32.mrb[87].mxu1  ;;  %4456 = vlog2.f32 %v2719_v28 }
 0x841   :  { %v2720_v57 = vmax.f32 %v2709_v41, 1e-10  ;;  %v4453_v37 = vpop.eup %4452 }
 0x842   :  { %v2713_v38 = vpop.f32.mrb[88].mxu1  ;;  %v2723_v20 = vmul.f32 0.6931472, %v4453_v37 }
 0x843   :  { %4458 = vlog2.f32 %v2720_v57  ;;  %v2714_v24 = vadd.f32 %v2713_v38, %v2624_v48  ;;  %v3925_v58 = vpop.f32.mrb[89].mxu1 }
 0x845   :  { %v4455_v27 = vpop.eup %4454  ;;  %v2721_v16 = vmax.f32 %v2714_v24, 1e-10 }
 0x846   :  { %v2725_v15 = vmul.f32 0.6931472, %v4455_v27 }
 0x847   :  { %4460 = vlog2.f32 %v2721_v16  ;;  %s4292_s7 = spop %4291 }
 0x848   :  { %v4249_v63 = vpack.c.bf16 %v2725_v15, %v2723_v20 }
 0x849   :  { %v4457_v43 = vpop.eup %4456 }
 0x84a   :  { %4250 = vmatpush3.bf16.msra.mxu0 %v4249_v63  ;;  %v2727_v55 = vmul.f32 0.6931472, %v4457_v43 }
 0x84b   :  { %4251 = vmatprep.subr.bf16.mxu0 %v5776_v59 }
 0x84d   :  { %v4459_v25 = vpop.eup %4458 }
 0x84e   :  { %v2729_v9 = vmul.f32 0.6931472, %v4459_v25 }
 0x850   :  { %v4252_v45 = vpack.c.bf16 %v2729_v9, %v2727_v55 }
 0x851   :  { %v4461_v8 = vpop.eup %4460 }
 0x852   :  { %4253 = vmatpush3.bf16.msra.mxu0 %v4252_v45  ;;  %v2731_v53 = vmul.f32 0.6931472, %v4461_v8 }
 0x853   :  { %3934 = vmatprep.subr.mxu0 %v5777_v4 }
 0x856   :  { %3935 = vmatpush3.msra.mxu0 %v2731_v53 }
 0x857   :  { %3937 = vmatmul.mubr.msk.f32.vlgmr.msra.gmra.mrb[74].mxu0 %vm1647_vm15, %v2736_v11  ;;  %4254 = vmatprep.subr.bf16.mxu0 %v5776_v59 }
 0x858   :  { %4256 = vmatpush3.bf16.msra.mxu0 %v5401_v23  ;;  %3959 = vmatprep.mubr.msk.f32.mxu0 %vm4525_vm8, %v5777_v4  ;;  %v2885_v23 = vstv %s4292_s7 }
 0x859   :  { %4257 = vmatprep.subr.bf16.mxu0 %v5776_v59 }
 0x85c   :  { %4259 = vmatpush3.bf16.msra.mxu0 %v5419_v22 }
 0x85d   :  { %4260 = vmatprep.subr.bf16.mxu0 %v5776_v59 }
 0x860   :  { %4262 = vmatpush3.bf16.msra.mxu0 %v5436_v1 }
 0x861   :  { %4263 = vmatprep.subr.bf16.mxu0 %v5776_v59 }
 0x864   :  { %4265 = vmatpush3.bf16.msra.mxu0 %v5443_v2 }
 0x865   :  { %4266 = vmatprep.subr.bf16.mxu0 %v5776_v59 }
 0x868   :  { %4268 = vmatpush3.bf16.msra.mxu0 %v5450_v7  ;;  %v1890_v7 = vpop.xlane.xlu0 %1889 }
 0x869   :  { %3962 = vmatprep.subr.mxu0 %v5777_v4  ;;  %v1891_v3 = vsub.f32 %v5628_v50, %v1890_v7 }
 0x86b   :  { %v1892_v46 = vmul.f32 1.442695, %v1891_v3 }
 0x92a   :  { %v2806_v49 = vpop.f32.mrb[74].mxu0 }
 0x92b   :  { %3960 = vmatmul.mubr.msk.f32.vlgmr.msra.gmra.mrb[76].mxu0 %vm1721_vm1, %v2806_v49  ;;  %v3938_v51 = vpop.f32.mrb[75].mxu0 }
 0x92c   :  { %3964 = vmatprep.mubr.msk.f32.mxu0 %vm4525_vm8, %v5777_v4 }
 0x9fe   :  { %v2879_v22 = vpop.f32.mrb[76].mxu0 }
 0x9ff   :  { %v2887_v1 = vmul.f32 %v2885_v23, %v2879_v22  ;;  %v3961_v2 = vpop.f32.mrb[77].mxu0 }
 0xa01   :  { %4462 = vtanh.f32 %v2887_v1 }
 0xa02   :  { %4464 = vpow2.f32 %v1892_v46 }
 0xa0b   :  { %v4463_v59 = vpop.eup %4462 }
 0xa0c   :  { %3963 = vmatpush3.xpose.msk.msra.mxu0 %vm1810_vm3, %v4463_v59  ;;  %v4465_v5 = vpop.eup %4464 }
 0xa0d   :  { %v1894_v14 = vsel %vm1887_vm0, %v4465_v5, 0.0 }
 0xa0f   :  { %3965 = vmatmul.mubr.msk.f32.vlgmr.msra.gmra.mrb[78].mxu0 %vm1810_vm3, %v5485_v61 }
 0xae2   :  { %v2958_v60 = vpop.f32.mrb[78].mxu0 }
 0xae3   :  { %v2959_v4 = vadd.f32 %v2958_v60, %v5625_v52  ;;  %v3966_v47 = vpop.f32.mrb[79].mxu0 }
 0xae5   :  { %v2962_v21 = vsel %vm1887_vm0, %v2959_v4, -inf }
 0xae6   :  { %2963 = vmax.xlane.f32.xlu1 %v2962_v21 }
 0xaea   :  { %1895 = vadd.xlane.f32.xlu1 %v1894_v14 }
 0xb73   :  { %v2964_v56 = vpop.xlane.xlu1 %2963 }
 0xb74   :  { %v2965_v62 = vsub.f32 %v2959_v4, %v2964_v56 }
 0xb76   :  { %v2966_v17 = vmul.f32 1.442695, %v2965_v62 }
 0xb77   :  { %v1896_v35 = vpop.xlane.xlu1 %1895 }
 0xb78   :  { %4466 = vpow2.f32 %v2966_v17 }
 0xb79   :  { %4468 = vlog2.f32 %v1896_v35 }
 0xb82   :  { %v4467_v61 = vpop.eup %4466 }
 0xb83   :  { %v2968_v50 = vsel %vm1887_vm0, %v4467_v61, 0.0  ;;  %v4469_v52 = vpop.eup %4468 }
 0xb84   :  { %2969 = vadd.xlane.f32.xlu0 %v2968_v50  ;;  %v1898_v30 = vmul.f32 0.6931472, %v4469_v52 }
 0xb86   :  { %v1899_v48 = vsub.f32 %v1891_v3, %v1898_v30 }
 0xc11   :  { %v2970_v31 = vpop.xlane.xlu0 %2969 }
 0xc12   :  { %4470 = vlog2.f32 %v2970_v31 }
 0xc1c   :  { %v4471_v6 = vpop.eup %4470 }
 0xc1d   :  { %v2972_v42 = vmul.f32 0.6931472, %v4471_v6 }
 0xc1f   :  { %v2973_v26 = vsub.f32 %v2965_v62, %v2972_v42 }
 0xc21   :  { %v2975_v33 = vrot.slane %v2973_v26, 7 }
 0xc23   :  { %v2978_v36 = vsel %vm2977_vm4, %v1899_v48, %v2975_v33 }
 0xc24   :  { %2980 = vst.msk [vmem:[#allocation3] sm:$0x3] %vm2979_vm5, %v2978_v36 }
 0xc25   :  { %4509 = shalt.err (!%p4506_p4)
}
 0xc26   :  { %s4510_s20 = scalar_lea.hbm %s5750_s11, 32 }
 0xc27   :  { %p4511_p5 = scmp.ne.s32.totalorder %s5750_s11, %s4510_s20  ;;  %p4514_p6 = scmp.lt.u32.totalorder %s4510_s20, %s5750_s11 }
 0xc29   :  { %p4516_p7 = pnand %p4514_p6, %p4511_p5 }
 0xc2b   :  { %4519 = shalt.err (!%p4516_p7)
}
 0xc2c   :  { %2990 = dma.vmem_to_hbm [thread:$0]  %s2988_s1, 32, %s5750_s11, [#allocation4]  }
 0xc2d   :  { %4520 = dma.done.wait [#allocation4], 32  }
 0xc2e   :  { %4521 = vsyncadd [#allocation4], 4294967264 }
 0xc2f   :  { %2994 = vsyncpa [#allocation4], 1 }

</bundles_post_ra>
